<compile_context>
chip_gen: v6e
topology: v6e:2x2x1
jax: 0.10.0
libtpu: 0.0.40
codegen_flags: <defaults>
</compile_context>

<pallas_src>
import functools

import jax
import jax.numpy as jnp
from jax.experimental import pallas as pl
from jax.experimental.pallas import tpu as pltpu


# ----------------------------- Pallas kernel ------------------------------

def _chebnet_fused_kernel(a_ref, x_ref, *refs, k, lambda_max):
    """Fused ChebNet forward: refs = (w0, b0, w1, b1, ..., out_ref)."""
    o_ref = refs[-1]
    layer_refs = refs[:-1]
    num_layers = len(layer_refs) // 2
    re_norm = 2.0 / lambda_max

    # Normalized adjacency: loaded once, kept as a bf16 MXU operand.
    a_bf = a_ref[...].astype(jnp.bfloat16)
    # Node features stay f32 for the VPU-side recursion math.
    h = x_ref[...].astype(jnp.float32)

    # Python loops -> fully unrolled at trace time (k and num_layers are static).
    for li in range(num_layers):
        w_ref = layer_refs[2 * li]        # (k * f_in_pad, f_out_pad)
        b_ref = layer_refs[2 * li + 1]    # (1, f_out_pad)

        # Chebyshev basis recursion with L~ = re_norm*(I - A_norm) - I.
        # Only MXU operands are bf16; scale/adds stay in f32.
        bases = [h]
        x0 = h
        if k > 1:
            ax0 = jnp.dot(a_bf, x0.astype(jnp.bfloat16),
                          preferred_element_type=jnp.float32)
            x1 = -re_norm * ax0
            if re_norm != 1.0:               # vanishes for lambda_max == 2
                x1 = x1 + (re_norm - 1.0) * x0
            bases.append(x1)
            for _ in range(2, k):
                ax1 = jnp.dot(a_bf, x1.astype(jnp.bfloat16),
                              preferred_element_type=jnp.float32)
                x2 = (-2.0 * re_norm) * ax1 - x0
                if re_norm != 1.0:
                    x2 = x2 + (2.0 * (re_norm - 1.0)) * x1
                bases.append(x2)
                x0, x1 = x1, x2

        # One lane-concatenated (N, k*f_in) @ (k*f_in, f_out) MXU stream per layer
        # instead of k separate K=f_in matmuls; weight loaded straight into the dot.
        xcat = jnp.concatenate(bases, axis=1).astype(jnp.bfloat16)
        acc = jnp.dot(xcat, w_ref[...].astype(jnp.bfloat16),
                      preferred_element_type=jnp.float32)

        # Bias + ReLU (DGL ChebConv default activation on every layer), in f32.
        h = jnp.maximum(acc + b_ref[...], 0.0)

    o_ref[...] = h.astype(o_ref.dtype)


# ------------------------------ wrapper ------------------------------------

def _round_up(x, m):
    return ((x + m - 1) // m) * m


def chebnet_forward(a_norm, features, layer_params, *, k, lambda_max=2.0):
    """layer_params: list of (w_list, b) with w_list = [W_t (f_in, f_out)] * k,
    b of shape (f_out,).  Returns (N, n_classes)."""
    n = features.shape[0]
    lane = 128
    n_pad = _round_up(n, lane)

    widths = [features.shape[1]] + [b.shape[0] for (_, b) in layer_params]
    pwidths = [_round_up(w, lane) for w in widths]

    # Lane-dense, zero-padded operands.  Padding is exact: A_norm's pad rows/cols
    # are zero (pad nodes can never feed real rows even though pad rows become
    # relu(bias) after the first layer), zero feature columns hit zero weight
    # rows/cols and zero bias, and the output is sliced back below.
    a_pad = jnp.zeros((n_pad, n_pad), jnp.float32).at[:n, :n].set(
        a_norm.astype(jnp.float32))
    x_pad = jnp.zeros((n_pad, pwidths[0]), jnp.float32).at[:n, :widths[0]].set(
        features.astype(jnp.float32))

    kernel_args = [a_pad, x_pad]
    in_specs = [
        pl.BlockSpec(a_pad.shape, lambda i: (0, 0)),
        pl.BlockSpec(x_pad.shape, lambda i: (0, 0)),
    ]
    for li, (w_list, b) in enumerate(layer_params):
        f_in, f_out = widths[li], widths[li + 1]
        f_in_p, f_out_p = pwidths[li], pwidths[li + 1]
        w_pad = jnp.zeros((k * f_in_p, f_out_p), jnp.float32)
        for t in range(k):
            w_pad = w_pad.at[t * f_in_p:t * f_in_p + f_in, :f_out].set(
                w_list[t].astype(jnp.float32))
        b_pad = jnp.zeros((1, f_out_p), jnp.float32).at[0, :f_out].set(
            b.astype(jnp.float32))
        kernel_args += [w_pad, b_pad]
        in_specs += [
            pl.BlockSpec(w_pad.shape, lambda i: (0, 0)),
            pl.BlockSpec(b_pad.shape, lambda i: (0, 0)),
        ]

    out_pad = pl.pallas_call(
        functools.partial(_chebnet_fused_kernel, k=k, lambda_max=lambda_max),
        out_shape=jax.ShapeDtypeStruct((n_pad, pwidths[-1]), jnp.float32),
        grid=(1,),
        in_specs=in_specs,
        out_specs=pl.BlockSpec((n_pad, pwidths[-1]), lambda i: (0, 0)),
        compiler_params=pltpu.CompilerParams(
            dimension_semantics=("arbitrary",)),
    )(*kernel_args)

    return out_pad[:n, :widths[-1]]


# ------------------------------ reference -----------------------------------

def chebnet_reference(a_norm, features, layer_params, *, k, lambda_max=2.0):
    hi = jax.lax.Precision.HIGHEST
    re_norm = 2.0 / lambda_max
    h = features
    for w_list, b in layer_params:
        x0 = h
        acc = jnp.dot(x0, w_list[0], precision=hi)
        if k > 1:
            x1 = -re_norm * jnp.dot(a_norm, x0, precision=hi) \
                 + (re_norm - 1.0) * x0
            acc = acc + jnp.dot(x1, w_list[1], precision=hi)
            for t in range(2, k):
                x2 = -2.0 * re_norm * jnp.dot(a_norm, x1, precision=hi) \
                     + 2.0 * (re_norm - 1.0) * x1 - x0
                acc = acc + jnp.dot(x2, w_list[t], precision=hi)
                x0, x1 = x1, x2
        h = jnp.maximum(acc + b, 0.0)
    return h


# --------------------------------- main --------------------------------------

if __name__ == "__main__":
    N_NODES = 64
    IN_FEATS = 32
    N_HIDDEN = 32
    N_CLASSES = 8
    N_LAYERS = 2          # -> ChebConv(32,32), ChebConv(32,32), ChebConv(32,8)
    CHEB_K = 3            # Chebyshev filter order k
    LAMBDA_MAX = 2.0      # ChebNet.forward passes lambda_max=[2]

    key = jax.random.PRNGKey(0)
    num_conv = N_LAYERS + 1
    keys = jax.random.split(key, 2 + num_conv * (CHEB_K + 1))
    k_feat, k_adj = keys[0], keys[1]
    k_params = keys[2:]

    # Node features.
    features = jax.random.normal(k_feat, (N_NODES, IN_FEATS), dtype=jnp.float32)

    # Deterministic synthetic graph: symmetric random adjacency + self loops,
    # symmetric degree normalization A_norm = D^{-1/2} A D^{-1/2}.
    a_rand = jax.random.bernoulli(k_adj, 0.08, (N_NODES, N_NODES))
    adj = (a_rand | a_rand.T | jnp.eye(N_NODES, dtype=bool)).astype(jnp.float32)
    deg = jnp.maximum(adj.sum(axis=1), 1.0)
    d_inv_sqrt = 1.0 / jnp.sqrt(deg)
    a_norm = d_inv_sqrt[:, None] * adj * d_inv_sqrt[None, :]

    # ChebConv parameters: PyTorch Linear(k*f_in, f_out) weight stored as k
    # per-order (f_in, f_out) blocks (transposed), plus bias (f_out,).
    layer_dims = [(IN_FEATS, N_HIDDEN)] + [(N_HIDDEN, N_HIDDEN)] * (N_LAYERS - 1) \
                 + [(N_HIDDEN, N_CLASSES)]
    layer_params = []
    pi = 0
    for (fin, fout) in layer_dims:
        bound = 1.0 / jnp.sqrt(jnp.float32(CHEB_K * fin))
        w_list = []
        for _ in range(CHEB_K):
            w_list.append(jax.random.uniform(
                k_params[pi], (fin, fout), minval=-bound, maxval=bound,
                dtype=jnp.float32))
            pi += 1
        b = jax.random.uniform(k_params[pi], (fout,), minval=-bound,
                               maxval=bound, dtype=jnp.float32)
        pi += 1
        layer_params.append((w_list, b))

    out = chebnet_forward(a_norm, features, layer_params,
                          k=CHEB_K, lambda_max=LAMBDA_MAX)
    out = jax.block_until_ready(out)

    ref = chebnet_reference(a_norm, features, layer_params,
                            k=CHEB_K, lambda_max=LAMBDA_MAX)
    assert out.shape == (N_NODES, N_CLASSES)
    max_err = float(jnp.max(jnp.abs(out - ref)))
    # bf16 MXU operands with f32 accumulation vs. f32-HIGHEST reference.
    assert jnp.allclose(out, ref, atol=3e-2, rtol=3e-2), max_err

    print("KERNEL_OK")
</pallas_src>

<mosaic_0001>
module attributes {stable_mosaic.version = 11 : i64} {
  func.func @_chebnet_fused_kernel(%arg0: i32, %arg1: memref<128x128xf32, #tpu.memory_space<vmem>>, %arg2: memref<128x128xf32, #tpu.memory_space<vmem>>, %arg3: memref<384x128xf32, #tpu.memory_space<vmem>>, %arg4: memref<1x128xf32, #tpu.memory_space<vmem>>, %arg5: memref<384x128xf32, #tpu.memory_space<vmem>>, %arg6: memref<1x128xf32, #tpu.memory_space<vmem>>, %arg7: memref<384x128xf32, #tpu.memory_space<vmem>>, %arg8: memref<1x128xf32, #tpu.memory_space<vmem>>, %arg9: memref<128x128xf32, #tpu.memory_space<vmem>>) attributes {dimension_semantics = [#tpu.dimension_semantics<arbitrary>], iteration_bounds = array<i64: 1>, scalar_prefetch = 0 : i64, scratch_operands = 0 : i64, tpu.core_type = #tpu.core_type<tc>, window_params = [{pipeline_mode = #tpu.pipeline_mode<synchronous>, transform_indices = @transform_0, window_bounds = array<i64: 128, 128>}, {pipeline_mode = #tpu.pipeline_mode<synchronous>, transform_indices = @transform_1, window_bounds = array<i64: 128, 128>}, {pipeline_mode = #tpu.pipeline_mode<synchronous>, transform_indices = @transform_2, window_bounds = array<i64: 384, 128>}, {pipeline_mode = #tpu.pipeline_mode<synchronous>, transform_indices = @transform_3, window_bounds = array<i64: 1, 128>}, {pipeline_mode = #tpu.pipeline_mode<synchronous>, transform_indices = @transform_4, window_bounds = array<i64: 384, 128>}, {pipeline_mode = #tpu.pipeline_mode<synchronous>, transform_indices = @transform_5, window_bounds = array<i64: 1, 128>}, {pipeline_mode = #tpu.pipeline_mode<synchronous>, transform_indices = @transform_6, window_bounds = array<i64: 384, 128>}, {pipeline_mode = #tpu.pipeline_mode<synchronous>, transform_indices = @transform_7, window_bounds = array<i64: 1, 128>}, {pipeline_mode = #tpu.pipeline_mode<synchronous>, transform_indices = @transform_8, window_bounds = array<i64: 128, 128>}]} {
    %c0 = arith.constant 0 : index
    %c0_0 = arith.constant 0 : index
    %0 = vector.load %arg1[%c0, %c0_0] : memref<128x128xf32, #tpu.memory_space<vmem>>, vector<128x128xf32>
    %1 = arith.truncf %0 : vector<128x128xf32> to vector<128x128xbf16>
    %c0_1 = arith.constant 0 : index
    %c0_2 = arith.constant 0 : index
    %2 = vector.load %arg2[%c0_1, %c0_2] : memref<128x128xf32, #tpu.memory_space<vmem>>, vector<128x128xf32>
    %3 = arith.truncf %2 : vector<128x128xf32> to vector<128x128xbf16>
    %cst = arith.constant dense<0.000000e+00> : vector<128x128xf32>
    %4 = tpu.matmul %1, %3, %cst {dimension_numbers = #tpu.dot_dimension_numbers<[1], [0], [0], [1], [0, 0, 1, 1], [], []>} : vector<128x128xbf16>, vector<128x128xbf16>, vector<128x128xf32> -> vector<128x128xf32>
    %cst_3 = arith.constant -1.000000e+00 : f32
    %5 = vector.broadcast %cst_3 : f32 to vector<128x128xf32>
    %6 = arith.mulf %5, %4 : vector<128x128xf32>
    %7 = arith.truncf %6 : vector<128x128xf32> to vector<128x128xbf16>
    %cst_4 = arith.constant dense<0.000000e+00> : vector<128x128xf32>
    %8 = tpu.matmul %1, %7, %cst_4 {dimension_numbers = #tpu.dot_dimension_numbers<[1], [0], [0], [1], [0, 0, 1, 1], [], []>} : vector<128x128xbf16>, vector<128x128xbf16>, vector<128x128xf32> -> vector<128x128xf32>
    %cst_5 = arith.constant -2.000000e+00 : f32
    %9 = vector.broadcast %cst_5 : f32 to vector<128x128xf32>
    %10 = arith.mulf %9, %8 : vector<128x128xf32>
    %11 = arith.subf %10, %2 : vector<128x128xf32>
    %12 = tpu.concatenate %2, %6, %11 in 1 : vector<128x128xf32>, vector<128x128xf32>, vector<128x128xf32> -> vector<128x384xf32>
    %13 = arith.truncf %12 : vector<128x384xf32> to vector<128x384xbf16>
    %c0_6 = arith.constant 0 : index
    %c0_7 = arith.constant 0 : index
    %14 = vector.load %arg3[%c0_6, %c0_7] : memref<384x128xf32, #tpu.memory_space<vmem>>, vector<384x128xf32>
    %15 = arith.truncf %14 : vector<384x128xf32> to vector<384x128xbf16>
    %cst_8 = arith.constant dense<0.000000e+00> : vector<128x128xf32>
    %16 = tpu.matmul %13, %15, %cst_8 {dimension_numbers = #tpu.dot_dimension_numbers<[1], [0], [0], [1], [0, 0, 1, 1], [], []>} : vector<128x384xbf16>, vector<384x128xbf16>, vector<128x128xf32> -> vector<128x128xf32>
    %c0_9 = arith.constant 0 : index
    %c0_10 = arith.constant 0 : index
    %17 = vector.load %arg4[%c0_9, %c0_10] : memref<1x128xf32, #tpu.memory_space<vmem>>, vector<1x128xf32>
    %18 = vector.broadcast %17 : vector<1x128xf32> to vector<128x128xf32>
    %19 = arith.addf %16, %18 : vector<128x128xf32>
    %cst_11 = arith.constant 0.000000e+00 : f32
    %20 = vector.broadcast %cst_11 : f32 to vector<128x128xf32>
    %21 = arith.maximumf %19, %20 : vector<128x128xf32>
    %22 = arith.truncf %21 : vector<128x128xf32> to vector<128x128xbf16>
    %cst_12 = arith.constant dense<0.000000e+00> : vector<128x128xf32>
    %23 = tpu.matmul %1, %22, %cst_12 {dimension_numbers = #tpu.dot_dimension_numbers<[1], [0], [0], [1], [0, 0, 1, 1], [], []>} : vector<128x128xbf16>, vector<128x128xbf16>, vector<128x128xf32> -> vector<128x128xf32>
    %cst_13 = arith.constant -1.000000e+00 : f32
    %24 = vector.broadcast %cst_13 : f32 to vector<128x128xf32>
    %25 = arith.mulf %24, %23 : vector<128x128xf32>
    %26 = arith.truncf %25 : vector<128x128xf32> to vector<128x128xbf16>
    %cst_14 = arith.constant dense<0.000000e+00> : vector<128x128xf32>
    %27 = tpu.matmul %1, %26, %cst_14 {dimension_numbers = #tpu.dot_dimension_numbers<[1], [0], [0], [1], [0, 0, 1, 1], [], []>} : vector<128x128xbf16>, vector<128x128xbf16>, vector<128x128xf32> -> vector<128x128xf32>
    %cst_15 = arith.constant -2.000000e+00 : f32
    %28 = vector.broadcast %cst_15 : f32 to vector<128x128xf32>
    %29 = arith.mulf %28, %27 : vector<128x128xf32>
    %30 = arith.subf %29, %21 : vector<128x128xf32>
    %31 = tpu.concatenate %21, %25, %30 in 1 : vector<128x128xf32>, vector<128x128xf32>, vector<128x128xf32> -> vector<128x384xf32>
    %32 = arith.truncf %31 : vector<128x384xf32> to vector<128x384xbf16>
    %c0_16 = arith.constant 0 : index
    %c0_17 = arith.constant 0 : index
    %33 = vector.load %arg5[%c0_16, %c0_17] : memref<384x128xf32, #tpu.memory_space<vmem>>, vector<384x128xf32>
    %34 = arith.truncf %33 : vector<384x128xf32> to vector<384x128xbf16>
    %cst_18 = arith.constant dense<0.000000e+00> : vector<128x128xf32>
    %35 = tpu.matmul %32, %34, %cst_18 {dimension_numbers = #tpu.dot_dimension_numbers<[1], [0], [0], [1], [0, 0, 1, 1], [], []>} : vector<128x384xbf16>, vector<384x128xbf16>, vector<128x128xf32> -> vector<128x128xf32>
    %c0_19 = arith.constant 0 : index
    %c0_20 = arith.constant 0 : index
    %36 = vector.load %arg6[%c0_19, %c0_20] : memref<1x128xf32, #tpu.memory_space<vmem>>, vector<1x128xf32>
    %37 = vector.broadcast %36 : vector<1x128xf32> to vector<128x128xf32>
    %38 = arith.addf %35, %37 : vector<128x128xf32>
    %cst_21 = arith.constant 0.000000e+00 : f32
    %39 = vector.broadcast %cst_21 : f32 to vector<128x128xf32>
    %40 = arith.maximumf %38, %39 : vector<128x128xf32>
    %41 = arith.truncf %40 : vector<128x128xf32> to vector<128x128xbf16>
    %cst_22 = arith.constant dense<0.000000e+00> : vector<128x128xf32>
    %42 = tpu.matmul %1, %41, %cst_22 {dimension_numbers = #tpu.dot_dimension_numbers<[1], [0], [0], [1], [0, 0, 1, 1], [], []>} : vector<128x128xbf16>, vector<128x128xbf16>, vector<128x128xf32> -> vector<128x128xf32>
    %cst_23 = arith.constant -1.000000e+00 : f32
    %43 = vector.broadcast %cst_23 : f32 to vector<128x128xf32>
    %44 = arith.mulf %43, %42 : vector<128x128xf32>
    %45 = arith.truncf %44 : vector<128x128xf32> to vector<128x128xbf16>
    %cst_24 = arith.constant dense<0.000000e+00> : vector<128x128xf32>
    %46 = tpu.matmul %1, %45, %cst_24 {dimension_numbers = #tpu.dot_dimension_numbers<[1], [0], [0], [1], [0, 0, 1, 1], [], []>} : vector<128x128xbf16>, vector<128x128xbf16>, vector<128x128xf32> -> vector<128x128xf32>
    %cst_25 = arith.constant -2.000000e+00 : f32
    %47 = vector.broadcast %cst_25 : f32 to vector<128x128xf32>
    %48 = arith.mulf %47, %46 : vector<128x128xf32>
    %49 = arith.subf %48, %40 : vector<128x128xf32>
    %50 = tpu.concatenate %40, %44, %49 in 1 : vector<128x128xf32>, vector<128x128xf32>, vector<128x128xf32> -> vector<128x384xf32>
    %51 = arith.truncf %50 : vector<128x384xf32> to vector<128x384xbf16>
    %c0_26 = arith.constant 0 : index
    %c0_27 = arith.constant 0 : index
    %52 = vector.load %arg7[%c0_26, %c0_27] : memref<384x128xf32, #tpu.memory_space<vmem>>, vector<384x128xf32>
    %53 = arith.truncf %52 : vector<384x128xf32> to vector<384x128xbf16>
    %cst_28 = arith.constant dense<0.000000e+00> : vector<128x128xf32>
    %54 = tpu.matmul %51, %53, %cst_28 {dimension_numbers = #tpu.dot_dimension_numbers<[1], [0], [0], [1], [0, 0, 1, 1], [], []>} : vector<128x384xbf16>, vector<384x128xbf16>, vector<128x128xf32> -> vector<128x128xf32>
    %c0_29 = arith.constant 0 : index
    %c0_30 = arith.constant 0 : index
    %55 = vector.load %arg8[%c0_29, %c0_30] : memref<1x128xf32, #tpu.memory_space<vmem>>, vector<1x128xf32>
    %56 = vector.broadcast %55 : vector<1x128xf32> to vector<128x128xf32>
    %57 = arith.addf %54, %56 : vector<128x128xf32>
    %cst_31 = arith.constant 0.000000e+00 : f32
    %58 = vector.broadcast %cst_31 : f32 to vector<128x128xf32>
    %59 = arith.maximumf %57, %58 : vector<128x128xf32>
    %c0_32 = arith.constant 0 : index
    %c0_33 = arith.constant 0 : index
    %60 = vector.load %arg9[%c0_32, %c0_33] : memref<128x128xf32, #tpu.memory_space<vmem>>, vector<128x128xf32>
    tpu.vector_store %arg9[%c0_32, %c0_33], %59 {strides = array<i32>} : memref<128x128xf32, #tpu.memory_space<vmem>>, vector<128x128xf32>,
    return
  }
  func.func @transform_0(%arg0: i32) -> (i32, i32) {
    %c0_i32 = arith.constant 0 : i32
    %c0_i32_0 = arith.constant 0 : i32
    %c0_i32_1 = arith.constant 0 : i32
    return %c0_i32, %c0_i32_0 : i32, i32
  }
  func.func @transform_1(%arg0: i32) -> (i32, i32) {
    %c0_i32 = arith.constant 0 : i32
    %c0_i32_0 = arith.constant 0 : i32
    %c0_i32_1 = arith.constant 0 : i32
    return %c0_i32, %c0_i32_0 : i32, i32
  }
  func.func @transform_2(%arg0: i32) -> (i32, i32) {
    %c0_i32 = arith.constant 0 : i32
    %c0_i32_0 = arith.constant 0 : i32
    %c0_i32_1 = arith.constant 0 : i32
    return %c0_i32, %c0_i32_0 : i32, i32
  }
  func.func @transform_3(%arg0: i32) -> (i32, i32) {
    %c0_i32 = arith.constant 0 : i32
    %c0_i32_0 = arith.constant 0 : i32
    %c0_i32_1 = arith.constant 0 : i32
    return %c0_i32, %c0_i32_0 : i32, i32
  }
  func.func @transform_4(%arg0: i32) -> (i32, i32) {
    %c0_i32 = arith.constant 0 : i32
    %c0_i32_0 = arith.constant 0 : i32
    %c0_i32_1 = arith.constant 0 : i32
    return %c0_i32, %c0_i32_0 : i32, i32
  }
  func.func @transform_5(%arg0: i32) -> (i32, i32) {
    %c0_i32 = arith.constant 0 : i32
    %c0_i32_0 = arith.constant 0 : i32
    %c0_i32_1 = arith.constant 0 : i32
    return %c0_i32, %c0_i32_0 : i32, i32
  }
  func.func @transform_6(%arg0: i32) -> (i32, i32) {
    %c0_i32 = arith.constant 0 : i32
    %c0_i32_0 = arith.constant 0 : i32
    %c0_i32_1 = arith.constant 0 : i32
    return %c0_i32, %c0_i32_0 : i32, i32
  }
  func.func @transform_7(%arg0: i32) -> (i32, i32) {
    %c0_i32 = arith.constant 0 : i32
    %c0_i32_0 = arith.constant 0 : i32
    %c0_i32_1 = arith.constant 0 : i32
    return %c0_i32, %c0_i32_0 : i32, i32
  }
  func.func @transform_8(%arg0: i32) -> (i32, i32) {
    %c0_i32 = arith.constant 0 : i32
    %c0_i32_0 = arith.constant 0 : i32
    %c0_i32_1 = arith.constant 0 : i32
    return %c0_i32, %c0_i32_0 : i32, i32
  }
}

</mosaic_0001>

<bundles_post_ra>
// kernel: tpu_custom_call.1
= control target key start
LH: loop header
LB: loop body
LE: loop exit
PB: predicated region body
PF: predicated region fallthrough
CT: control target
= control target key end

     0   :  { %13 = vsyncpa [#allocation3], 0  ;;  %s3345_s0 = inlined_call_operand.hbm [shape: f32[128,128], index: 0, kind: input, shape index: {}]   ;;  %s3346_s1 = inlined_call_operand.hbm [shape: f32[128,128], index: 1, kind: input, shape index: {}]   ;;  %s3347_s2 = inlined_call_operand.hbm [shape: f32[384,128], index: 2, kind: input, shape index: {}]   ;;  %s3348_s3 = inlined_call_operand.vmem [shape: f32[1,128], index: 3, kind: input, shape index: {}]   ;;  %s3349_s4 = inlined_call_operand.hbm [shape: f32[384,128], index: 4, kind: input, shape index: {}]   ;;  %s3350_s5 = inlined_call_operand.vmem [shape: f32[1,128], index: 5, kind: input, shape index: {}]   ;;  %s3351_s6 = inlined_call_operand.hbm [shape: f32[384,128], index: 6, kind: input, shape index: {}]   ;;  %s3352_s7 = inlined_call_operand.vmem [shape: f32[1,128], index: 7, kind: input, shape index: {}]   ;;  %s3353_s8 = inlined_call_operand.hbm [shape: f32[128,128], index: 8, kind: output, shape index: {}]  }
   0x1   :  { %14 = vsyncpa [#allocation6], 0 }
   0x2   :  { %15 = vsyncpa [#allocation9], 0 }
   0x3   :  { %16 = vsyncpa [#allocation4], 0  ;;  %s2602_s27 = smov [#allocation5]   ;;  %s2603_s29 = smov [#allocation8]  }
   0x4   :  { %s34_s28 = sshll.u32 %s2602_s27, 4  ;;  %s60_s30 = sshll.u32 %s2603_s29, 4  ;;  %s35_s28 = int_to_ptr.vmem [resolvable:$true] %s34_s28  ;;  %s61_s30 = int_to_ptr.vmem [resolvable:$true] %s60_s30 }
   0x5   :  { %s2482_s9 = scalar_lea.vmem %s35_s28, 2048  ;;  %p2487_p1 = scmp.lt.s32.totalorder %s35_s28, %s35_s28 }
   0x6   :  { %p2483_p0 = scmp.ne.s32.totalorder %s35_s28, %s2482_s9  ;;  %p2488_p2 = scmp.lt.s32.totalorder %s2482_s9, %s2482_s9 }
   0x8   :  { %p2489_p3 = por %p2488_p2, %p2487_p1 }
   0xa   :  { %p2490_p4 = pnand %p2489_p3, %p2483_p0 }
   0xc   :  { %2493 = shalt.err (!%p2490_p4)
}
   0xd   :  { %s2604_s10 = smov 128   ;;  %s2605_s11 = smov 8  }
   0xe   :  { %40 = dma.hbm_to_vmem [thread:$0]  %s3346_s1, 2048, %s35_s28, [#allocation6], %s2604_s10, %s2604_s10, %s2605_s11  }
   0xf   :  { %s2502_s14 = scalar_lea.vmem %s61_s30, 6144  ;;  %p2507_p6 = scmp.lt.s32.totalorder %s61_s30, %s61_s30 }
  0x10   :  { %p2503_p5 = scmp.ne.s32.totalorder %s61_s30, %s2502_s14  ;;  %p2508_p7 = scmp.lt.s32.totalorder %s2502_s14, %s2502_s14 }
  0x12   :  { %p2509_p8 = por %p2508_p7, %p2507_p6 }
  0x14   :  { %p2510_p9 = pnand %p2509_p8, %p2503_p5 }
  0x16   :  { %2513 = shalt.err (!%p2510_p9)
}
  0x17   :  { %66 = dma.hbm_to_vmem [thread:$0]  %s3349_s4, 6144, %s61_s30, [#allocation9], %s2604_s10, %s2604_s10, %s2605_s11  }
  0x18   :  { %s2606_s17 = smov [#allocation2]   ;;  %s2607_s19 = smov [#allocation7]  }
  0x19   :  { %s22_s18 = sshll.u32 %s2606_s17, 4  ;;  %s46_s20 = sshll.u32 %s2607_s19, 4  ;;  %s23_s18 = int_to_ptr.vmem [resolvable:$true] %s22_s18  ;;  %s47_s20 = int_to_ptr.vmem [resolvable:$true] %s46_s20 }
  0x1a   :  { %s2522_s1 = scalar_lea.vmem %s23_s18, 2048  ;;  %p2527_p11 = scmp.lt.s32.totalorder %s23_s18, %s23_s18 }
  0x1b   :  { %p2523_p10 = scmp.ne.s32.totalorder %s23_s18, %s2522_s1  ;;  %p2528_p12 = scmp.lt.s32.totalorder %s2522_s1, %s2522_s1 }
  0x1d   :  { %p2529_p13 = por %p2528_p12, %p2527_p11 }
  0x1f   :  { %p2530_p0 = pnand %p2529_p13, %p2523_p10 }
  0x21   :  { %2533 = shalt.err (!%p2530_p0)
}
  0x22   :  { %28 = dma.hbm_to_vmem [thread:$0]  %s3345_s0, 2048, %s23_s18, [#allocation3], %s2604_s10, %s2604_s10, %s2605_s11  }
  0x23   :  { %s2542_s4 = scalar_lea.vmem %s47_s20, 6144  ;;  %p2547_p2 = scmp.lt.s32.totalorder %s47_s20, %s47_s20 }
  0x24   :  { %p2543_p1 = scmp.ne.s32.totalorder %s47_s20, %s2542_s4  ;;  %p2548_p3 = scmp.lt.s32.totalorder %s2542_s4, %s2542_s4 }
  0x26   :  { %p2549_p4 = por %p2548_p3, %p2547_p2 }
  0x28   :  { %p2550_p5 = pnand %p2549_p4, %p2543_p1 }
  0x2a   :  { %2553 = shalt.err (!%p2550_p5)
}
  0x2b   :  { %52 = dma.hbm_to_vmem [thread:$0]  %s3347_s2, 6144, %s47_s20, [#allocation6], %s2604_s10, %s2604_s10, %s2605_s11  }
  0x2c   :  { %s2608_s25 = smov [#allocation10]  }
  0x2d   :  { %s74_s26 = sshll.u32 %s2608_s25, 4  ;;  %s75_s26 = int_to_ptr.vmem [resolvable:$true] %s74_s26 }
  0x2e   :  { %s2562_s27 = scalar_lea.vmem %s75_s26, 6144  ;;  %p2567_p7 = scmp.lt.s32.totalorder %s75_s26, %s75_s26 }
  0x2f   :  { %p2563_p6 = scmp.ne.s32.totalorder %s75_s26, %s2562_s27  ;;  %p2568_p8 = scmp.lt.s32.totalorder %s2562_s27, %s2562_s27 }
  0x31   :  { %p2569_p9 = por %p2568_p8, %p2567_p7 }
  0x33   :  { %p2570_p10 = pnand %p2569_p9, %p2563_p6 }
  0x35   :  { %2573 = shalt.err (!%p2570_p10)
}
  0x36   :  { %80 = dma.hbm_to_vmem [thread:$0]  %s3351_s6, 6144, %s75_s26, [#allocation9], %s2604_s10, %s2604_s10, %s2605_s11  }
  0x37   :  { %2594 = dma.done.wait [#allocation3], 2048  }
  0x38   :  { %2595 = vsyncadd [#allocation3], 4294965248 }
  0x39   :  { %2596 = dma.done.wait [#allocation6], 8192  }
  0x3a   :  { %2597 = vsyncadd [#allocation6], 4294959104 }
  0x3b   :  { %2598 = dma.done.wait [#allocation9], 12288  }
  0x3c   :  { %2599 = vsyncadd [#allocation9], 4294955008  ;;  %v2685_v0 = vld [vmem:[#allocation5 + $0x70] sm:$0xff]  ;;  %v2687_v1 = vld [vmem:[#allocation5 + $0x78] sm:$0xff] }
  0x3d   :  { %v2689_v2 = vld [vmem:[#allocation5 + $0x60] sm:$0xff]  ;;  %v2693_v3 = vpack.c.bf16 %v2687_v1, %v2685_v0  ;;  %v2695_v4 = vld [vmem:[#allocation5 + $0x68] sm:$0xff]  ;;  %v2701_v6 = vld [vmem:[#allocation5 + $0x50] sm:$0xff] }
  0x3e   :  { %v2699_v5 = vpack.c.bf16 %v2695_v4, %v2689_v2  ;;  %v2703_v7 = vld [vmem:[#allocation5 + $0x58] sm:$0xff]  ;;  %v99_v9 = vld [vmem:[#allocation2] sm:$0xff]  ;;  %v100_v10 = vld [vmem:[#allocation2 + $0x8] sm:$0xff] }
  0x3f   :  { %2178 = vmatprep.subr.bf16.mxu0 %v2693_v3  ;;  %v2710_v8 = vpack.c.bf16 %v2703_v7, %v2701_v6  ;;  %v2712_v11 = vld [vmem:[#allocation5 + $0x40] sm:$0xff]  ;;  %v2714_v12 = vld [vmem:[#allocation5 + $0x48] sm:$0xff]  ;;  %v2716_v13 = vpack.c.bf16 %v100_v10, %v99_v9  ;;  %v2726_v15 = vld [vmem:[#allocation5 + $0x30] sm:$0xff] }
  0x40   :  { %2179 = vmatpush3.bf16.msra.mxu0 %v2693_v3  ;;  %v2723_v14 = vpack.c.bf16 %v2714_v12, %v2712_v11  ;;  %v2728_v16 = vld [vmem:[#allocation5 + $0x38] sm:$0xff]  ;;  %v2736_v18 = vld [vmem:[#allocation5 + $0x20] sm:$0xff]  ;;  %v2738_v19 = vld [vmem:[#allocation5 + $0x28] sm:$0xff] }
  0x41   :  { %2180 = vmatprep.subr.bf16.mxu0 %v2699_v5  ;;  %2194 = vmatprep.mubr.bf16.mxu0 %v2716_v13  ;;  %v2734_v17 = vpack.c.bf16 %v2728_v16, %v2726_v15  ;;  %v2744_v20 = vpack.c.bf16 %v2738_v19, %v2736_v18  ;;  %v2746_v21 = vld [vmem:[#allocation5 + $0x10] sm:$0xff]  ;;  %v2748_v22 = vld [vmem:[#allocation5 + $0x18] sm:$0xff]  ;;  %v2756_v24 = vld [vmem:[#allocation5] sm:$0xff] }
  0x42   :  { %2226 = vmatprep.mubr.bf16.mxu1 %v2716_v13  ;;  %v2754_v23 = vpack.c.bf16 %v2748_v22, %v2746_v21  ;;  %v2758_v25 = vld [vmem:[#allocation5 + $0x8] sm:$0xff]  ;;  %v435_v27 = vld [vmem:[#allocation7 + $0xf0] sm:$0xff]  ;;  %v436_v28 = vld [vmem:[#allocation7 + $0xf8] sm:$0xff] }
  0x43   :  { %v2764_v26 = vpack.c.bf16 %v2758_v25, %v2756_v24  ;;  %v101_v29 = vld [vmem:[#allocation2 + $0x10] sm:$0xff]  ;;  %v102_v30 = vld [vmem:[#allocation2 + $0x18] sm:$0xff]  ;;  %v103_v31 = vld [vmem:[#allocation2 + $0x20] sm:$0xff]  ;;  %v468_v33 = vpack.c.bf16 %v436_v28, %v435_v27 }
  0x44   :  { %2181 = vmatpush3.bf16.msra.mxu0 %v2699_v5  ;;  %v104_v32 = vld [vmem:[#allocation2 + $0x28] sm:$0xff]  ;;  %v419_v34 = vld [vmem:[#allocation7 + $0x70] sm:$0xff]  ;;  %v420_v35 = vld [vmem:[#allocation7 + $0x78] sm:$0xff]  ;;  %v2768_v38 = vpack.c.bf16 %v102_v30, %v101_v29 }
  0x45   :  { %2182 = vmatprep.subr.bf16.mxu0 %v2710_v8  ;;  %v433_v36 = vld [vmem:[#allocation7 + $0xe0] sm:$0xff]  ;;  %v434_v37 = vld [vmem:[#allocation7 + $0xe8] sm:$0xff]  ;;  %v2771_v39 = vpack.c.bf16 %v104_v32, %v103_v31  ;;  %v460_v40 = vpack.c.bf16 %v420_v35, %v419_v34  ;;  %v431_v44 = vld [vmem:[#allocation7 + $0xd0] sm:$0xff] }
  0x46   :  { %v467_v41 = vpack.c.bf16 %v434_v37, %v433_v36  ;;  %v417_v42 = vld [vmem:[#allocation7 + $0x60] sm:$0xff]  ;;  %v418_v43 = vld [vmem:[#allocation7 + $0x68] sm:$0xff]  ;;  %v432_v45 = vld [vmem:[#allocation7 + $0xd8] sm:$0xff] }
  0x47   :  { %v105_v46 = vld [vmem:[#allocation2 + $0x30] sm:$0xff]  ;;  %v106_v47 = vld [vmem:[#allocation2 + $0x38] sm:$0xff]  ;;  %v107_v48 = vld [vmem:[#allocation2 + $0x40] sm:$0xff]  ;;  %v459_v49 = vpack.c.bf16 %v418_v43, %v417_v42  ;;  %v466_v51 = vpack.c.bf16 %v432_v45, %v431_v44 }
  0x48   :  { %2183 = vmatpush3.bf16.msra.mxu0 %v2710_v8  ;;  %v108_v50 = vld [vmem:[#allocation2 + $0x48] sm:$0xff]  ;;  %v415_v52 = vld [vmem:[#allocation7 + $0x50] sm:$0xff]  ;;  %v416_v53 = vld [vmem:[#allocation7 + $0x58] sm:$0xff]  ;;  %v2775_v56 = vpack.c.bf16 %v106_v47, %v105_v46 }
  0x49   :  { %2184 = vmatprep.subr.bf16.mxu0 %v2723_v14  ;;  %v429_v54 = vld [vmem:[#allocation7 + $0xc0] sm:$0xff]  ;;  %v430_v55 = vld [vmem:[#allocation7 + $0xc8] sm:$0xff]  ;;  %v2777_v57 = vpack.c.bf16 %v108_v50, %v107_v48  ;;  %v458_v58 = vpack.c.bf16 %v416_v53, %v415_v52  ;;  %v427_v62 = vld [vmem:[#allocation7 + $0xb0] sm:$0xff] }
  0x4a   :  { %v465_v59 = vpack.c.bf16 %v430_v55, %v429_v54  ;;  %v413_v60 = vld [vmem:[#allocation7 + $0x40] sm:$0xff]  ;;  %v414_v61 = vld [vmem:[#allocation7 + $0x48] sm:$0xff]  ;;  %v428_v63 = vld [vmem:[#allocation7 + $0xb8] sm:$0xff] }
  0x4b   :  { %v109_v9 = vld [vmem:[#allocation2 + $0x50] sm:$0xff]  ;;  %v110_v10 = vld [vmem:[#allocation2 + $0x58] sm:$0xff]  ;;  %v111_v27 = vld [vmem:[#allocation2 + $0x60] sm:$0xff]  ;;  %v457_v28 = vpack.c.bf16 %v414_v61, %v413_v60  ;;  %v464_v30 = vpack.c.bf16 %v428_v63, %v427_v62 }
  0x4c   :  { %2185 = vmatpush3.bf16.msra.mxu0 %v2723_v14  ;;  %v112_v29 = vld [vmem:[#allocation2 + $0x68] sm:$0xff]  ;;  %v411_v31 = vld [vmem:[#allocation7 + $0x30] sm:$0xff]  ;;  %v412_v32 = vld [vmem:[#allocation7 + $0x38] sm:$0xff] }
  0x4d   :  { %2186 = vmatprep.subr.bf16.mxu0 %v2734_v17  ;;  %v2783_v34 = vpack.c.bf16 %v112_v29, %v111_v27  ;;  %v456_v35 = vpack.c.bf16 %v412_v32, %v411_v31  ;;  %v113_v36 = vld [vmem:[#allocation2 + $0x70] sm:$0xff]  ;;  %v114_v37 = vld [vmem:[#allocation2 + $0x78] sm:$0xff]  ;;  %v426_v42 = vld [vmem:[#allocation7 + $0xa8] sm:$0xff] }
  0x4e   :  { %v409_v44 = vld [vmem:[#allocation7 + $0x20] sm:$0xff]  ;;  %v410_v45 = vld [vmem:[#allocation7 + $0x28] sm:$0xff]  ;;  %v423_v47 = vld [vmem:[#allocation7 + $0x90] sm:$0xff] }
  0x4f   :  { %v455_v46 = vpack.c.bf16 %v410_v45, %v409_v44  ;;  %v424_v48 = vld [vmem:[#allocation7 + $0x98] sm:$0xff]  ;;  %v407_v50 = vld [vmem:[#allocation7 + $0x10] sm:$0xff]  ;;  %v421_v53 = vld [vmem:[#allocation7 + $0x80] sm:$0xff] }
  0x50   :  { %2187 = vmatpush3.bf16.msra.mxu0 %v2734_v17  ;;  %v422_v54 = vld [vmem:[#allocation7 + $0x88] sm:$0xff] }
  0x51   :  { %2188 = vmatprep.subr.bf16.mxu0 %v2744_v20  ;;  %v461_v55 = vpack.c.bf16 %v422_v54, %v421_v53 }
  0x54   :  { %2189 = vmatpush3.bf16.msra.mxu0 %v2744_v20 }
  0x55   :  { %2190 = vmatprep.subr.bf16.mxu0 %v2754_v23 }
  0x58   :  { %2191 = vmatpush3.bf16.msra.mxu0 %v2754_v23 }
  0x59   :  { %2192 = vmatprep.subr.bf16.mxu0 %v2764_v26 }
  0x5c   :  { %2193 = vmatpush3.bf16.msra.mxu0 %v2764_v26 }
  0x5d   :  { %1874 = vmatprep.subr.bf16.mxu0 %v468_v33  ;;  %v2781_v33 = vpack.c.bf16 %v110_v10, %v109_v9 }
  0x5f   :  { %2195 = vmatmul.mubr.bf16.vlgmr.msra.gmra.mxu0 %v2768_v38 }
  0x60   :  { %2198 = vmatprep.mubr.bf16.mxu0 %v2771_v39  ;;  %1875 = vmatpush3.bf16.msra.mxu0 %v460_v40  ;;  %v2787_v40 = vpack.c.bf16 %v114_v37, %v113_v36 }
  0x61   :  { %1876 = vmatprep.subr.bf16.mxu0 %v467_v41  ;;  %v425_v41 = vld [vmem:[#allocation7 + $0xa0] sm:$0xff] }
  0x62   :  { %v463_v43 = vpack.c.bf16 %v426_v42, %v425_v41 }
  0x64   :  { %1877 = vmatpush3.bf16.msra.mxu0 %v459_v49  ;;  %v462_v49 = vpack.c.bf16 %v424_v48, %v423_v47 }
  0x65   :  { %1878 = vmatprep.subr.bf16.mxu0 %v466_v51  ;;  %v408_v51 = vld [vmem:[#allocation7 + $0x18] sm:$0xff] }
  0x66   :  { %v454_v52 = vpack.c.bf16 %v408_v51, %v407_v50 }
  0x67   :  { %2199 = vmatmul.mubr.bf16.gmra.mxu0 %v2775_v56 }
  0x68   :  { %2202 = vmatprep.mubr.bf16.mxu0 %v2777_v57  ;;  %1879 = vmatpush3.bf16.msra.mxu0 %v458_v58  ;;  %v405_v58 = vld [vmem:[#allocation7] sm:$0xff] }
  0x69   :  { %1880 = vmatprep.subr.bf16.mxu0 %v465_v59  ;;  %v406_v59 = vld [vmem:[#allocation7 + $0x8] sm:$0xff] }
  0x6a   :  { %v453_v60 = vpack.c.bf16 %v406_v59, %v405_v58 }
  0x6c   :  { %1881 = vmatpush3.bf16.msra.mxu0 %v457_v28 }
  0x6d   :  { %1882 = vmatprep.subr.bf16.mxu0 %v464_v30 }
  0x6f   :  { %2203 = vmatmul.mubr.bf16.gmra.mxu0 %v2781_v33 }
  0x70   :  { %2206 = vmatprep.mubr.bf16.mxu0 %v2783_v34  ;;  %1883 = vmatpush3.bf16.msra.mxu0 %v456_v35 }
  0x71   :  { %1884 = vmatprep.subr.bf16.mxu0 %v463_v43 }
  0x74   :  { %1885 = vmatpush3.bf16.msra.mxu0 %v455_v46 }
  0x75   :  { %1886 = vmatprep.subr.bf16.mxu0 %v462_v49 }
  0x77   :  { %2207 = vmatmul.mubr.bf16.gmra.mxu0 %v2787_v40 }
  0x78   :  { %1887 = vmatpush3.bf16.msra.mxu0 %v454_v52 }
  0x79   :  { %1888 = vmatprep.subr.bf16.mxu0 %v461_v55 }
  0x7c   :  { %1889 = vmatpush3.bf16.msra.mxu0 %v453_v60 }
 0x11f   :  { %v2196_v61 = vpop.f32.mrf.mxu0 }
 0x120   :  { %v246_v30 = vmul.f32 -1.0, %v2196_v61 }
 0x121   :  { %v181_v62 = vpop.f32.mrf.mxu0 }
 0x122   :  { %v244_v10 = vmul.f32 -1.0, %v181_v62 }
 0x123   :  { %v2197_v63 = vpop.f32.mrf.mxu0 }
 0x124   :  { %v247_v27 = vmul.f32 -1.0, %v2197_v63 }
 0x125   :  { %v184_v9 = vpop.f32.mrf.mxu0 }
 0x126   :  { %v245_v28 = vmul.f32 -1.0, %v184_v9  ;;  %v261_v35 = vpack.c.bf16 %v247_v27, %v246_v30 }
 0x127   :  { %v2200_v29 = vpop.f32.mrf.mxu0 }
 0x128   :  { %v2790_v31 = vpack.c.bf16 %v245_v28, %v244_v10  ;;  %v250_v50 = vmul.f32 -1.0, %v2200_v29  ;;  %v449_v29 = vld [vmem:[#allocation7 + $0x160] sm:$0xff] }
 0x129   :  { %v197_v32 = vpop.f32.mrf.mxu0 }
 0x12a   :  { %516 = vmatprep.mubr.bf16.mxu0 %v2790_v31  ;;  %v248_v43 = vmul.f32 -1.0, %v197_v32  ;;  %v447_v32 = vld [vmem:[#allocation7 + $0x150] sm:$0xff] }
 0x12b   :  { %v2201_v36 = vpop.f32.mrf.mxu0  ;;  %517 = vmatmul.mubr.bf16.vlgmr.msra.gmra.mxu0 %v2764_v26 }
 0x12c   :  { %524 = vmatprep.mubr.bf16.mxu0 %v261_v35  ;;  %v251_v48 = vmul.f32 -1.0, %v2201_v36  ;;  %v445_v36 = vld [vmem:[#allocation7 + $0x140] sm:$0xff] }
 0x12d   :  { %v200_v37 = vpop.f32.mrf.mxu0 }
 0x12e   :  { %v249_v41 = vmul.f32 -1.0, %v200_v37  ;;  %v263_v52 = vpack.c.bf16 %v251_v48, %v250_v50  ;;  %v446_v37 = vld [vmem:[#allocation7 + $0x148] sm:$0xff]  ;;  %v437_v48 = vld [vmem:[#allocation7 + $0x100] sm:$0xff] }
 0x12f   :  { %v2204_v42 = vpop.f32.mrf.mxu0 }
 0x130   :  { %v262_v45 = vpack.c.bf16 %v249_v41, %v248_v43  ;;  %v254_v9 = vmul.f32 -1.0, %v2204_v42  ;;  %v444_v41 = vld [vmem:[#allocation7 + $0x138] sm:$0xff]  ;;  %v442_v43 = vld [vmem:[#allocation7 + $0x128] sm:$0xff] }
 0x131   :  { %v213_v44 = vpop.f32.mrf.mxu0 }
 0x132   :  { %v252_v62 = vmul.f32 -1.0, %v213_v44 }
 0x133   :  { %v2205_v46 = vpop.f32.mrf.mxu0  ;;  %525 = vmatmul.mubr.bf16.gmra.mxu0 %v2754_v23 }
 0x134   :  { %532 = vmatprep.mubr.bf16.mxu0 %v262_v45  ;;  %v255_v23 = vmul.f32 -1.0, %v2205_v46  ;;  %v440_v46 = vld [vmem:[#allocation7 + $0x118] sm:$0xff] }
 0x135   :  { %v216_v47 = vpop.f32.mrf.mxu0 }
 0x136   :  { %v253_v58 = vmul.f32 -1.0, %v216_v47  ;;  %v265_v27 = vpack.c.bf16 %v255_v23, %v254_v9 }
 0x137   :  { %v2208_v49 = vpop.f32.mrf.mxu0 }
 0x138   :  { %v258_v26 = vmul.f32 -1.0, %v2208_v49  ;;  %v264_v10 = vpack.c.bf16 %v253_v58, %v252_v62  ;;  %v438_v49 = vld [vmem:[#allocation7 + $0x108] sm:$0xff] }
 0x139   :  { %v229_v51 = vpop.f32.mrf.mxu0  ;;  %v469_v50 = vpack.c.bf16 %v438_v49, %v437_v48 }
 0x13a   :  { %v256_v59 = vmul.f32 -1.0, %v229_v51 }
 0x13b   :  { %v2209_v53 = vpop.f32.mrf.mxu0  ;;  %533 = vmatmul.mubr.bf16.gmra.mxu0 %v2744_v20  ;;  %v451_v20 = vld [vmem:[#allocation7 + $0x170] sm:$0xff] }
 0x13c   :  { %v259_v54 = vmul.f32 -1.0, %v2209_v53  ;;  %540 = vmatprep.mubr.bf16.mxu0 %v263_v52 }
 0x13d   :  { %v232_v55 = vpop.f32.mrf.mxu0 }
 0x13e   :  { %v267_v60 = vpack.c.bf16 %v259_v54, %v258_v26  ;;  %v257_v61 = vmul.f32 -1.0, %v232_v55 }
 0x140   :  { %v266_v63 = vpack.c.bf16 %v257_v61, %v256_v59  ;;  %2210 = vmatprep.subr.bf16.mxu1 %v267_v60 }
 0x141   :  { %2211 = vmatpush3.bf16.msra.mxu1 %v267_v60 }
 0x142   :  { %2212 = vmatprep.subr.bf16.mxu1 %v266_v63 }
 0x143   :  { %541 = vmatmul.mubr.bf16.gmra.mxu0 %v2734_v17  ;;  %v452_v17 = vld [vmem:[#allocation7 + $0x178] sm:$0xff] }
 0x144   :  { %548 = vmatprep.mubr.bf16.mxu0 %v264_v10  ;;  %v476_v28 = vpack.c.bf16 %v452_v17, %v451_v20 }
 0x145   :  { %2213 = vmatpush3.bf16.msra.mxu1 %v266_v63 }
 0x146   :  { %2214 = vmatprep.subr.bf16.mxu1 %v265_v27 }
 0x149   :  { %2215 = vmatpush3.bf16.msra.mxu1 %v265_v27 }
 0x14a   :  { %2216 = vmatprep.subr.bf16.mxu1 %v264_v10 }
 0x14b   :  { %549 = vmatmul.mubr.bf16.gmra.mxu0 %v2723_v14  ;;  %v450_v14 = vld [vmem:[#allocation7 + $0x168] sm:$0xff] }
 0x14c   :  { %556 = vmatprep.mubr.bf16.mxu0 %v265_v27  ;;  %v475_v30 = vpack.c.bf16 %v450_v14, %v449_v29 }
 0x14d   :  { %2217 = vmatpush3.bf16.msra.mxu1 %v264_v10 }
 0x14e   :  { %2218 = vmatprep.subr.bf16.mxu1 %v263_v52 }
 0x151   :  { %2219 = vmatpush3.bf16.msra.mxu1 %v263_v52 }
 0x152   :  { %2220 = vmatprep.subr.bf16.mxu1 %v262_v45 }
 0x153   :  { %557 = vmatmul.mubr.bf16.gmra.mxu0 %v2710_v8  ;;  %v448_v8 = vld [vmem:[#allocation7 + $0x158] sm:$0xff] }
 0x154   :  { %564 = vmatprep.mubr.bf16.mxu0 %v266_v63 }
 0x155   :  { %2221 = vmatpush3.bf16.msra.mxu1 %v262_v45  ;;  %v439_v45 = vld [vmem:[#allocation7 + $0x110] sm:$0xff] }
 0x156   :  { %2222 = vmatprep.subr.bf16.mxu1 %v261_v35  ;;  %v470_v47 = vpack.c.bf16 %v440_v46, %v439_v45 }
 0x159   :  { %2223 = vmatpush3.bf16.msra.mxu1 %v261_v35  ;;  %v474_v35 = vpack.c.bf16 %v448_v8, %v447_v32 }
 0x15a   :  { %2224 = vmatprep.subr.bf16.mxu1 %v2790_v31 }
 0x15b   :  { %565 = vmatmul.mubr.bf16.gmra.mxu0 %v2699_v5  ;;  %v473_v5 = vpack.c.bf16 %v446_v37, %v445_v36 }
 0x15c   :  { %572 = vmatprep.mubr.bf16.mxu0 %v267_v60 }
 0x15d   :  { %2225 = vmatpush3.bf16.msra.mxu1 %v2790_v31  ;;  %v443_v31 = vld [vmem:[#allocation7 + $0x130] sm:$0xff] }
 0x15e   :  { %2242 = vmatprep.subr.bf16.mxu1 %v476_v28  ;;  %v472_v42 = vpack.c.bf16 %v444_v41, %v443_v31 }
 0x160   :  { %2227 = vmatmul.mubr.bf16.vlgmr.msra.gmra.mxu1 %v2768_v38 }
 0x161   :  { %2230 = vmatprep.mubr.bf16.mxu1 %v2771_v39  ;;  %2243 = vmatpush3.bf16.msra.mxu1 %v476_v28 }
 0x162   :  { %2244 = vmatprep.subr.bf16.mxu1 %v475_v30 }
 0x163   :  { %573 = vmatmul.mubr.bf16.gmra.mxu0 %v2693_v3  ;;  %v441_v3 = vld [vmem:[#allocation7 + $0x120] sm:$0xff] }
 0x164   :  { %2322 = vmatprep.mubr.bf16.mxu0 %v2716_v13  ;;  %v471_v44 = vpack.c.bf16 %v442_v43, %v441_v3 }
 0x165   :  { %2245 = vmatpush3.bf16.msra.mxu1 %v475_v30 }
 0x166   :  { %2246 = vmatprep.subr.bf16.mxu1 %v474_v35 }
 0x168   :  { %2231 = vmatmul.mubr.bf16.gmra.mxu1 %v2775_v56 }
 0x169   :  { %2234 = vmatprep.mubr.bf16.mxu1 %v2777_v57  ;;  %2247 = vmatpush3.bf16.msra.mxu1 %v474_v35 }
 0x16a   :  { %2248 = vmatprep.subr.bf16.mxu1 %v473_v5 }
 0x16d   :  { %2249 = vmatpush3.bf16.msra.mxu1 %v473_v5 }
 0x16e   :  { %2250 = vmatprep.subr.bf16.mxu1 %v472_v42 }
 0x170   :  { %2235 = vmatmul.mubr.bf16.gmra.mxu1 %v2781_v33 }
 0x171   :  { %2238 = vmatprep.mubr.bf16.mxu1 %v2783_v34  ;;  %2251 = vmatpush3.bf16.msra.mxu1 %v472_v42 }
 0x172   :  { %2252 = vmatprep.subr.bf16.mxu1 %v471_v44 }
 0x175   :  { %2253 = vmatpush3.bf16.msra.mxu1 %v471_v44 }
 0x176   :  { %2254 = vmatprep.subr.bf16.mxu1 %v470_v47 }
 0x178   :  { %2239 = vmatmul.mubr.bf16.gmra.mxu1 %v2787_v40 }
 0x179   :  { %2255 = vmatpush3.bf16.msra.mxu1 %v470_v47 }
 0x17a   :  { %2256 = vmatprep.subr.bf16.mxu1 %v469_v50 }
 0x17d   :  { %2257 = vmatpush3.bf16.msra.mxu1 %v469_v50 }
 0x1eb   :  { %v1890_v51 = vpop.f32.mrf.mxu0 }
 0x1ed   :  { %v1891_v52 = vpop.f32.mrf.mxu0 }
 0x1ee   :  { %v2811_v53 = vadd.f32 %v1891_v52, %v1890_v51 }
 0x1ef   :  { %v1893_v26 = vpop.f32.mrf.mxu0 }
 0x1f1   :  { %v1894_v54 = vpop.f32.mrf.mxu0 }
 0x1f2   :  { %v2813_v55 = vadd.f32 %v1894_v54, %v1893_v26 }
 0x1f3   :  { %v1896_v58 = vpop.f32.mrf.mxu0 }
 0x1f5   :  { %v1897_v59 = vpop.f32.mrf.mxu0 }
 0x1f6   :  { %v2815_v60 = vadd.f32 %v1897_v59, %v1896_v58 }
 0x1f7   :  { %v1899_v61 = vpop.f32.mrf.mxu0 }
 0x1f9   :  { %v1900_v62 = vpop.f32.mrf.mxu0 }
 0x1fa   :  { %v2817_v23 = vadd.f32 %v1900_v62, %v1899_v61 }
 0x220   :  { %v2228_v63 = vpop.f32.mrf.mxu1 }
 0x221   :  { %v367_v17 = vmul.f32 -2.0, %v2228_v63 }
 0x222   :  { %v302_v9 = vpop.f32.mrf.mxu1 }
 0x223   :  { %v365_v27 = vmul.f32 -2.0, %v302_v9  ;;  %v383_v35 = vsub.f32 %v367_v17, %v2746_v21 }
 0x224   :  { %v2229_v10 = vpop.f32.mrf.mxu1 }
 0x225   :  { %v368_v20 = vmul.f32 -2.0, %v2229_v10  ;;  %v381_v32 = vsub.f32 %v365_v27, %v2756_v24 }
 0x226   :  { %v305_v28 = vpop.f32.mrf.mxu1 }
 0x227   :  { %v366_v29 = vmul.f32 -2.0, %v305_v28  ;;  %v384_v14 = vsub.f32 %v368_v20, %v2748_v22 }
 0x228   :  { %v2232_v30 = vpop.f32.mrf.mxu1 }
 0x229   :  { %v382_v8 = vsub.f32 %v366_v29, %v2758_v25  ;;  %v398_v5 = vpack.c.bf16 %v384_v14, %v383_v35  ;;  %v371_v3 = vmul.f32 -2.0, %v2232_v30  ;;  %v2836_v14 = vpop.f32.mrf.mxu0 }
 0x22a   :  { %v318_v36 = vpop.f32.mrf.mxu1 }
 0x22b   :  { %v397_v37 = vpack.c.bf16 %v382_v8, %v381_v32  ;;  %v369_v41 = vmul.f32 -2.0, %v318_v36  ;;  %v387_v21 = vsub.f32 %v371_v3, %v2726_v15  ;;  %v2838_v30 = vpop.f32.mrf.mxu0 }
 0x22c   :  { %v2233_v31 = vpop.f32.mrf.mxu1 }
 0x22d   :  { %v372_v42 = vmul.f32 -2.0, %v2233_v31  ;;  %2258 = vmatprep.mubr.bf16.mxu1 %v397_v37  ;;  %v385_v24 = vsub.f32 %v369_v41, %v2736_v18  ;;  %v2840_v32 = vpop.f32.mrf.mxu0 }
 0x22e   :  { %v321_v43 = vpop.f32.mrf.mxu1  ;;  %2259 = vmatmul.mubr.bf16.vlgmr.msra.gmra.mxu1 %v398_v5 }
 0x22f   :  { %v370_v44 = vmul.f32 -2.0, %v321_v43  ;;  %v388_v22 = vsub.f32 %v372_v42, %v2728_v16  ;;  %v2842_v8 = vpop.f32.mrf.mxu0 }
 0x230   :  { %v2236_v45 = vpop.f32.mrf.mxu1 }
 0x231   :  { %v386_v25 = vsub.f32 %v370_v44, %v2738_v19  ;;  %v400_v49 = vpack.c.bf16 %v388_v22, %v387_v21  ;;  %v375_v52 = vmul.f32 -2.0, %v2236_v45 }
 0x232   :  { %v334_v46 = vpop.f32.mrf.mxu1 }
 0x233   :  { %v399_v47 = vpack.c.bf16 %v386_v25, %v385_v24  ;;  %v373_v50 = vmul.f32 -2.0, %v334_v46  ;;  %v391_v15 = vsub.f32 %v375_v52, %v2701_v6 }
 0x234   :  { %v2237_v48 = vpop.f32.mrf.mxu1 }
 0x235   :  { %v376_v51 = vmul.f32 -2.0, %v2237_v48  ;;  %2262 = vmatprep.mubr.bf16.mxu1 %v399_v47  ;;  %v389_v18 = vsub.f32 %v373_v50, %v2712_v11 }
 0x236   :  { %v337_v26 = vpop.f32.mrf.mxu1  ;;  %2263 = vmatmul.mubr.bf16.gmra.mxu1 %v400_v49 }
 0x237   :  { %v374_v54 = vmul.f32 -2.0, %v337_v26  ;;  %v392_v16 = vsub.f32 %v376_v51, %v2703_v7 }
 0x238   :  { %v2240_v58 = vpop.f32.mrf.mxu1 }
 0x239   :  { %v390_v19 = vsub.f32 %v374_v54, %v2714_v12  ;;  %v402_v63 = vpack.c.bf16 %v392_v16, %v391_v15  ;;  %v379_v27 = vmul.f32 -2.0, %v2240_v58 }
 0x23a   :  { %v350_v59 = vpop.f32.mrf.mxu1 }
 0x23b   :  { %v401_v61 = vpack.c.bf16 %v390_v19, %v389_v18  ;;  %v377_v9 = vmul.f32 -2.0, %v350_v59  ;;  %v395_v12 = vsub.f32 %v379_v27, %v2685_v0 }
 0x23c   :  { %v2241_v62 = vpop.f32.mrf.mxu1 }
 0x23d   :  { %v380_v10 = vmul.f32 -2.0, %v2241_v62  ;;  %2266 = vmatprep.mubr.bf16.mxu1 %v401_v61  ;;  %v393_v28 = vsub.f32 %v377_v9, %v2689_v2  ;;  %v2863_v62 = vld [vmem:[%s3348_s3] ss:$0 sm:$0xff] }
 0x23e   :  { %v353_v20 = vpop.f32.mrf.mxu1  ;;  %2267 = vmatmul.mubr.bf16.gmra.mxu1 %v402_v63 }
 0x23f   :  { %v378_v17 = vmul.f32 -2.0, %v353_v20  ;;  %v396_v7 = vsub.f32 %v380_v10, %v2687_v1  ;;  %v2844_v1 = vpop.f32.mrf.mxu0 }
 0x241   :  { %v394_v11 = vsub.f32 %v378_v17, %v2695_v4  ;;  %v404_v29 = vpack.c.bf16 %v396_v7, %v395_v12  ;;  %v2846_v2 = vpop.f32.mrf.mxu0 }
 0x243   :  { %v403_v6 = vpack.c.bf16 %v394_v11, %v393_v28  ;;  %v1911_v4 = vpop.f32.mrf.mxu0 }
 0x245   :  { %2270 = vmatprep.mubr.bf16.mxu1 %v403_v6  ;;  %v1912_v0 = vpop.f32.mrf.mxu0 }
 0x246   :  { %2271 = vmatmul.mubr.bf16.gmra.mxu1 %v404_v29 }
 0x247   :  { %2290 = vmatprep.mubr.bf16.mxu1 %v2716_v13  ;;  %v1914_v35 = vpop.f32.mrf.mxu0 }
 0x249   :  { %v1915_v36 = vpop.f32.mrf.mxu0 }
 0x24b   :  { %v1917_v37 = vpop.f32.mrf.mxu0 }
 0x24d   :  { %v1918_v5 = vpop.f32.mrf.mxu0 }
 0x24e   :  { %v1919_v12 = vadd.f32 %v1918_v5, %v1917_v37  ;;  %v1913_v5 = vadd.f32 %v1912_v0, %v1911_v4 }
 0x24f   :  { %v1920_v31 = vpop.f32.mrf.mxu0 }
 0x251   :  { %v1921_v41 = vpop.f32.mrf.mxu0 }
 0x252   :  { %v1922_v20 = vadd.f32 %v1921_v41, %v1920_v31 }
 0x253   :  { %v1923_v42 = vpop.f32.mrf.mxu0 }
 0x254   :  { %v559_v31 = vadd.f32 %v1922_v20, %v2863_v62 }
 0x255   :  { %v1924_v3 = vpop.f32.mrf.mxu0 }
 0x256   :  { %v1925_v9 = vadd.f32 %v1924_v3, %v1923_v42  ;;  %v1916_v3 = vadd.f32 %v1915_v36, %v1914_v35 }
 0x257   :  { %v1926_v43 = vpop.f32.mrf.mxu0 }
 0x258   :  { %v562_v29 = vadd.f32 %v1925_v9, %v2863_v62 }
 0x259   :  { %v1927_v44 = vpop.f32.mrf.mxu0 }
 0x25a   :  { %v1928_v59 = vadd.f32 %v1927_v44, %v1926_v43 }
 0x25b   :  { %v1929_v45 = vpop.f32.mrf.mxu0 }
 0x25c   :  { %v567_v28 = vadd.f32 %v1928_v59, %v2863_v62  ;;  %v1907_v59 = vadd.f32 %v2842_v8, %v2840_v32 }
 0x25d   :  { %v1930_v21 = vpop.f32.mrf.mxu0 }
 0x25e   :  { %v1931_v10 = vadd.f32 %v1930_v21, %v1929_v45 }
 0x25f   :  { %v1932_v48 = vpop.f32.mrf.mxu0 }
 0x260   :  { %v570_v42 = vadd.f32 %v1931_v10, %v2863_v62  ;;  %v538_v10 = vadd.f32 %v1907_v59, %v2863_v62  ;;  %v989_v59 = vld [vmem:[#allocation8 + $0xe8] sm:$0xff] }
 0x261   :  { %v1933_v51 = vpop.f32.mrf.mxu0 }
 0x262   :  { %v1934_v19 = vadd.f32 %v1933_v51, %v1932_v48  ;;  %v554_v51 = vadd.f32 %v1919_v12, %v2863_v62 }
 0x263   :  { %v1935_v26 = vpop.f32.mrf.mxu0 }
 0x264   :  { %v575_v27 = vadd.f32 %v1934_v19, %v2863_v62  ;;  %v551_v19 = vadd.f32 %v1916_v3, %v2863_v62 }
 0x265   :  { %v1936_v58 = vpop.f32.mrf.mxu0 }
 0x266   :  { %v1937_v61 = vadd.f32 %v1936_v58, %v1935_v26 }
 0x268   :  { %v578_v11 = vadd.f32 %v1937_v61, %v2863_v62 }
 0x2ee   :  { %v2848_v22 = vpop.f32.mrf.mxu1 }
 0x2f0   :  { %v2850_v24 = vpop.f32.mrf.mxu1 }
 0x2f2   :  { %v2852_v25 = vpop.f32.mrf.mxu1 }
 0x2f4   :  { %v2854_v46 = vpop.f32.mrf.mxu1 }
 0x2f6   :  { %v2264_v47 = vpop.f32.mrf.mxu1 }
 0x2f8   :  { %v2856_v49 = vpop.f32.mrf.mxu1 }
 0x2fa   :  { %v2265_v50 = vpop.f32.mrf.mxu1 }
 0x2fc   :  { %v2858_v52 = vpop.f32.mrf.mxu1 }
 0x2fe   :  { %v2268_v54 = vpop.f32.mrf.mxu1 }
 0x2ff   :  { %v2884_v26 = vadd.f32 %v2268_v54, %v559_v31  ;;  %v990_v31 = vld [vmem:[#allocation8 + $0xf0] sm:$0xff] }
 0x300   :  { %v647_v16 = vpop.f32.mrf.mxu1 }
 0x301   :  { %v2912_v61 = vadd.f32 %v647_v16, %v551_v19  ;;  %v988_v19 = vld [vmem:[#allocation8 + $0xe0] sm:$0xff] }
 0x302   :  { %v2269_v18 = vpop.f32.mrf.mxu1 }
 0x303   :  { %v2877_v45 = vadd.f32 %v2269_v18, %v562_v29  ;;  %v1910_v18 = vadd.f32 %v2846_v2, %v2844_v1  ;;  %v546_v1 = vadd.f32 %v1913_v5, %v2863_v62  ;;  %v3358_v2 = vmax.f32 %v2884_v26, 0.0 }
 0x304   :  { %v650_v15 = vpop.f32.mrf.mxu1 }
 0x305   :  { %v689_v4 = vmax.f32 %v2877_v45, 0.0  ;;  %v2898_v0 = vadd.f32 %v650_v15, %v554_v51  ;;  %v1904_v15 = vadd.f32 %v2838_v30, %v2836_v14  ;;  %v2918_v9 = vadd.f32 %v2265_v50, %v546_v1  ;;  %v974_v51 = vld [vmem:[#allocation8 + $0x70] sm:$0xff] }
 0x306   :  { %v2272_v63 = vpop.f32.mrf.mxu1  ;;  %v3360_v14 = vmax.f32 %v2912_v61, 0.0 }
 0x307   :  { %v2866_v7 = vadd.f32 %v2272_v63, %v575_v27  ;;  %v543_v63 = vadd.f32 %v1910_v18, %v2863_v62  ;;  %v2924_v32 = vpack.c.bf16 %v689_v4, %v3358_v2  ;;  %v3359_v8 = vmax.f32 %v2898_v0, 0.0  ;;  %v975_v18 = vld [vmem:[#allocation8 + $0x78] sm:$0xff] }
 0x308   :  { %v663_v17 = vpop.f32.mrf.mxu1  ;;  %v535_v30 = vadd.f32 %v1904_v15, %v2863_v62  ;;  %v685_v50 = vmax.f32 %v2918_v9, 0.0  ;;  %v2936_v27 = vadd.f32 %v2858_v52, %v538_v10  ;;  %v527_v52 = vadd.f32 %v2815_v60, %v2863_v62  ;;  %v973_v10 = vld [vmem:[#allocation8 + $0x68] sm:$0xff] }
 0x309   :  { %v2871_v43 = vadd.f32 %v663_v17, %v567_v28  ;;  %v3354_v21 = vmax.f32 %v2866_v7, 0.0  ;;  %v2928_v16 = vadd.f32 %v2264_v47, %v543_v63  ;;  %v2942_v20 = vpack.c.bf16 %v3359_v8, %v3360_v14  ;;  %v972_v63 = vld [vmem:[#allocation8 + $0x60] sm:$0xff] }
 0x30a   :  { %v2273_v6 = vpop.f32.mrf.mxu1  ;;  %v530_v47 = vadd.f32 %v2817_v23, %v2863_v62  ;;  %v2949_v28 = vadd.f32 %v2856_v49, %v535_v30  ;;  %v683_v23 = vmax.f32 %v2936_v27, 0.0  ;;  %v2966_v49 = vadd.f32 %v2848_v22, %v527_v52  ;;  %v986_v30 = vld [vmem:[#allocation8 + $0xd0] sm:$0xff] }
 0x30b   :  { %v2873_v44 = vadd.f32 %v2273_v6, %v578_v11  ;;  %v3356_v58 = vmax.f32 %v2871_v43, 0.0  ;;  %v684_v17 = vmax.f32 %v2928_v16, 0.0  ;;  %v522_v6 = vadd.f32 %v2813_v55, %v2863_v62 }
 0x30c   :  { %v666_v41 = vpop.f32.mrf.mxu1  ;;  %v2955_v11 = vadd.f32 %v2852_v25, %v530_v47  ;;  %v682_v60 = vmax.f32 %v2949_v28, 0.0  ;;  %v519_v25 = vadd.f32 %v2811_v53, %v2863_v62  ;;  %v680_v55 = vmax.f32 %v2966_v49, 0.0  ;;  %v987_v47 = vld [vmem:[#allocation8 + $0xd8] sm:$0xff] }
 0x30d   :  { %v3357_v48 = vmax.f32 %v2873_v44, 0.0  ;;  %v2881_v37 = vadd.f32 %v666_v41, %v570_v42  ;;  %v2961_v12 = vpack.c.bf16 %v685_v50, %v684_v17  ;;  %v2976_v42 = vadd.f32 %v2854_v46, %v522_v6  ;;  %v991_v41 = vld [vmem:[#allocation8 + $0xf8] sm:$0xff] }
 0x30e   :  { %v681_v29 = vmax.f32 %v2955_v11, 0.0  ;;  %v2982_v22 = vpack.c.bf16 %v683_v23, %v682_v60  ;;  %v2987_v3 = vadd.f32 %v2850_v24, %v519_v25  ;;  %v1023_v5 = vpack.c.bf16 %v991_v41, %v990_v31  ;;  %v970_v25 = vld [vmem:[#allocation8 + $0x50] sm:$0xff]  ;;  %v971_v31 = vld [vmem:[#allocation8 + $0x58] sm:$0xff]  ;;  %v984_v41 = vld [vmem:[#allocation8 + $0xc0] sm:$0xff] }
 0x30f   :  { %v2891_v35 = vpack.c.bf16 %v3357_v48, %v3354_v21  ;;  %v3355_v36 = vmax.f32 %v2881_v37, 0.0  ;;  %v679_v46 = vmax.f32 %v2976_v42, 0.0  ;;  %v1015_v1 = vpack.c.bf16 %v975_v18, %v974_v51  ;;  %v985_v21 = vld [vmem:[#allocation8 + $0xc8] sm:$0xff]  ;;  %v968_v18 = vld [vmem:[#allocation8 + $0x40] sm:$0xff] }
 0x310   :  { %v2994_v53 = vpack.c.bf16 %v681_v29, %v680_v55  ;;  %v678_v62 = vmax.f32 %v2987_v3, 0.0  ;;  %v1022_v15 = vpack.c.bf16 %v989_v59, %v988_v19  ;;  %v1014_v52 = vpack.c.bf16 %v973_v10, %v972_v63  ;;  %v969_v19 = vld [vmem:[#allocation8 + $0x48] sm:$0xff]  ;;  %v982_v59 = vld [vmem:[#allocation8 + $0xb0] sm:$0xff]  ;;  %v967_v10 = vld [vmem:[#allocation8 + $0x38] sm:$0xff] }
 0x311   :  { %v2904_v54 = vpack.c.bf16 %v3355_v36, %v3356_v58  ;;  %2274 = vmatprep.subr.bf16.mxu1 %v2891_v35  ;;  %v1021_v6 = vpack.c.bf16 %v987_v47, %v986_v30  ;;  %v1013_v51 = vpack.c.bf16 %v971_v31, %v970_v25  ;;  %v983_v36 = vld [vmem:[#allocation8 + $0xb8] sm:$0xff]  ;;  %v966_v63 = vld [vmem:[#allocation8 + $0x30] sm:$0xff]  ;;  %v981_v47 = vld [vmem:[#allocation8 + $0xa8] sm:$0xff]  ;;  %v3367_v27 = vmax.f32 %v2912_v61, 0.0 }
 0x312   :  { %2275 = vmatpush3.bf16.msra.mxu1 %v2891_v35  ;;  %v3004_v24 = vpack.c.bf16 %v679_v46, %v678_v62  ;;  %v1011_v30 = vpack.c.bf16 %v967_v10, %v966_v63  ;;  %v965_v25 = vld [vmem:[#allocation8 + $0x28] sm:$0xff]  ;;  %v960_v63 = vld [vmem:[#allocation8] sm:$0xff]  ;;  %v3368_v16 = vmax.f32 %v2898_v0, 0.0  ;;  %v3370_v61 = vmax.f32 %v2873_v44, 0.0 }
 0x313   :  { %2276 = vmatprep.subr.bf16.mxu1 %v2904_v54  ;;  %v961_v10 = vld [vmem:[#allocation8 + $0x8] sm:$0xff]  ;;  %v3371_v0 = vmax.f32 %v2871_v43, 0.0 }
 0x316   :  { %2277 = vmatpush3.bf16.msra.mxu1 %v2904_v54 }
 0x317   :  { %2278 = vmatprep.subr.bf16.mxu1 %v2924_v32 }
 0x31a   :  { %2279 = vmatpush3.bf16.msra.mxu1 %v2924_v32 }
 0x31b   :  { %2280 = vmatprep.subr.bf16.mxu1 %v2942_v20 }
 0x31e   :  { %2281 = vmatpush3.bf16.msra.mxu1 %v2942_v20 }
 0x31f   :  { %2282 = vmatprep.subr.bf16.mxu1 %v2961_v12 }
 0x322   :  { %2283 = vmatpush3.bf16.msra.mxu1 %v2961_v12 }
 0x323   :  { %2284 = vmatprep.subr.bf16.mxu1 %v2982_v22 }
 0x326   :  { %2285 = vmatpush3.bf16.msra.mxu1 %v2982_v22 }
 0x327   :  { %2286 = vmatprep.subr.bf16.mxu1 %v2994_v53 }
 0x32a   :  { %2287 = vmatpush3.bf16.msra.mxu1 %v2994_v53 }
 0x32b   :  { %2288 = vmatprep.subr.bf16.mxu1 %v3004_v24 }
 0x32e   :  { %2289 = vmatpush3.bf16.msra.mxu1 %v3004_v24 }
 0x32f   :  { %1986 = vmatprep.subr.bf16.mxu1 %v1023_v5  ;;  %v1020_v5 = vpack.c.bf16 %v985_v21, %v984_v41  ;;  %v980_v21 = vld [vmem:[#allocation8 + $0xa0] sm:$0xff]  ;;  %v979_v41 = vld [vmem:[#allocation8 + $0x98] sm:$0xff] }
 0x331   :  { %2291 = vmatmul.mubr.bf16.vlgmr.msra.gmra.mxu1 %v2768_v38 }
 0x332   :  { %2294 = vmatprep.mubr.bf16.mxu1 %v2771_v39  ;;  %1987 = vmatpush3.bf16.msra.mxu1 %v1015_v1  ;;  %v1012_v1 = vpack.c.bf16 %v969_v19, %v968_v18  ;;  %v963_v18 = vld [vmem:[#allocation8 + $0x18] sm:$0xff] }
 0x333   :  { %1988 = vmatprep.subr.bf16.mxu1 %v1022_v15  ;;  %v1019_v15 = vpack.c.bf16 %v983_v36, %v982_v59  ;;  %v978_v36 = vld [vmem:[#allocation8 + $0x90] sm:$0xff]  ;;  %v976_v59 = vld [vmem:[#allocation8 + $0x80] sm:$0xff] }
 0x336   :  { %1989 = vmatpush3.bf16.msra.mxu1 %v1014_v52  ;;  %v1018_v52 = vpack.c.bf16 %v981_v47, %v980_v21 }
 0x337   :  { %1990 = vmatprep.subr.bf16.mxu1 %v1021_v6  ;;  %v964_v6 = vld [vmem:[#allocation8 + $0x20] sm:$0xff] }
 0x338   :  { %v1010_v31 = vpack.c.bf16 %v965_v25, %v964_v6 }
 0x339   :  { %2295 = vmatmul.mubr.bf16.gmra.mxu1 %v2775_v56 }
 0x33a   :  { %2298 = vmatprep.mubr.bf16.mxu1 %v2777_v57  ;;  %1991 = vmatpush3.bf16.msra.mxu1 %v1013_v51  ;;  %v1017_v51 = vpack.c.bf16 %v979_v41, %v978_v36 }
 0x33b   :  { %1992 = vmatprep.subr.bf16.mxu1 %v1020_v5  ;;  %v962_v5 = vld [vmem:[#allocation8 + $0x10] sm:$0xff] }
 0x33c   :  { %v1009_v19 = vpack.c.bf16 %v963_v18, %v962_v5 }
 0x33e   :  { %1993 = vmatpush3.bf16.msra.mxu1 %v1012_v1  ;;  %v977_v1 = vld [vmem:[#allocation8 + $0x88] sm:$0xff] }
 0x33f   :  { %1994 = vmatprep.subr.bf16.mxu1 %v1019_v15  ;;  %v1016_v15 = vpack.c.bf16 %v977_v1, %v976_v59 }
 0x341   :  { %2299 = vmatmul.mubr.bf16.gmra.mxu1 %v2781_v33 }
 0x342   :  { %2302 = vmatprep.mubr.bf16.mxu1 %v2783_v34  ;;  %1995 = vmatpush3.bf16.msra.mxu1 %v1011_v30  ;;  %v1008_v30 = vpack.c.bf16 %v961_v10, %v960_v63 }
 0x343   :  { %1996 = vmatprep.subr.bf16.mxu1 %v1018_v52 }
 0x346   :  { %1997 = vmatpush3.bf16.msra.mxu1 %v1010_v31 }
 0x347   :  { %1998 = vmatprep.subr.bf16.mxu1 %v1017_v51 }
 0x349   :  { %2303 = vmatmul.mubr.bf16.gmra.mxu1 %v2787_v40 }
 0x34a   :  { %1999 = vmatpush3.bf16.msra.mxu1 %v1009_v19 }
 0x34b   :  { %2000 = vmatprep.subr.bf16.mxu1 %v1016_v15 }
 0x34e   :  { %2001 = vmatpush3.bf16.msra.mxu1 %v1008_v30 }
 0x3f1   :  { %v2292_v21 = vpop.f32.mrf.mxu1 }
 0x3f2   :  { %v801_v58 = vmul.f32 -1.0, %v2292_v21 }
 0x3f3   :  { %v736_v47 = vpop.f32.mrf.mxu1 }
 0x3f4   :  { %v799_v25 = vmul.f32 -1.0, %v736_v47 }
 0x3f5   :  { %v2293_v52 = vpop.f32.mrf.mxu1 }
 0x3f6   :  { %v802_v31 = vmul.f32 -1.0, %v2293_v52 }
 0x3f7   :  { %v739_v6 = vpop.f32.mrf.mxu1 }
 0x3f8   :  { %v800_v36 = vmul.f32 -1.0, %v739_v6  ;;  %v816_v18 = vpack.c.bf16 %v802_v31, %v801_v58 }
 0x3f9   :  { %v2296_v41 = vpop.f32.mrf.mxu1 }
 0x3fa   :  { %v815_v5 = vpack.c.bf16 %v800_v36, %v799_v25  ;;  %v805_v6 = vmul.f32 -1.0, %v2296_v41 }
 0x3fb   :  { %v752_v51 = vpop.f32.mrf.mxu1 }
 0x3fc   :  { %1071 = vmatprep.mubr.bf16.mxu1 %v815_v5  ;;  %v803_v63 = vmul.f32 -1.0, %v752_v51 }
 0x3fd   :  { %v2297_v19 = vpop.f32.mrf.mxu1  ;;  %1072 = vmatmul.mubr.bf16.vlgmr.msra.gmra.mxu1 %v3004_v24 }
 0x3fe   :  { %1079 = vmatprep.mubr.bf16.mxu1 %v816_v18  ;;  %v806_v21 = vmul.f32 -1.0, %v2297_v19 }
 0x3ff   :  { %v755_v59 = vpop.f32.mrf.mxu1 }
 0x400   :  { %v804_v1 = vmul.f32 -1.0, %v755_v59  ;;  %v818_v25 = vpack.c.bf16 %v806_v21, %v805_v6 }
 0x401   :  { %v2300_v15 = vpop.f32.mrf.mxu1 }
 0x402   :  { %v817_v30 = vpack.c.bf16 %v804_v1, %v803_v63  ;;  %v809_v19 = vmul.f32 -1.0, %v2300_v15  ;;  %v998_v15 = vld [vmem:[#allocation8 + $0x130] sm:$0xff] }
 0x403   :  { %v768_v10 = vpop.f32.mrf.mxu1 }
 0x404   :  { %v807_v8 = vmul.f32 -1.0, %v768_v10  ;;  %v999_v10 = vld [vmem:[#allocation8 + $0x138] sm:$0xff] }
 0x405   :  { %v2301_v48 = vpop.f32.mrf.mxu1  ;;  %1080 = vmatmul.mubr.bf16.gmra.mxu1 %v2994_v53 }
 0x406   :  { %1087 = vmatprep.mubr.bf16.mxu1 %v817_v30  ;;  %v810_v53 = vmul.f32 -1.0, %v2301_v48  ;;  %v1006_v48 = vld [vmem:[#allocation8 + $0x170] sm:$0xff] }
 0x407   :  { %v771_v47 = vpop.f32.mrf.mxu1 }
 0x408   :  { %v808_v51 = vmul.f32 -1.0, %v771_v47  ;;  %v820_v21 = vpack.c.bf16 %v810_v53, %v809_v19  ;;  %v996_v47 = vld [vmem:[#allocation8 + $0x120] sm:$0xff] }
 0x409   :  { %v2304_v52 = vpop.f32.mrf.mxu1 }
 0x40a   :  { %v813_v24 = vmul.f32 -1.0, %v2304_v52  ;;  %v819_v41 = vpack.c.bf16 %v808_v51, %v807_v8  ;;  %v1005_v8 = vld [vmem:[#allocation8 + $0x168] sm:$0xff] }
 0x40b   :  { %v784_v58 = vpop.f32.mrf.mxu1  ;;  %v997_v52 = vld [vmem:[#allocation8 + $0x128] sm:$0xff] }
 0x40c   :  { %v811_v2 = vmul.f32 -1.0, %v784_v58  ;;  %v1026_v6 = vpack.c.bf16 %v997_v52, %v996_v47  ;;  %v994_v58 = vld [vmem:[#allocation8 + $0x110] sm:$0xff] }
 0x40d   :  { %v2305_v31 = vpop.f32.mrf.mxu1  ;;  %1088 = vmatmul.mubr.bf16.gmra.mxu1 %v2982_v22  ;;  %v1000_v22 = vld [vmem:[#allocation8 + $0x140] sm:$0xff] }
 0x40e   :  { %v814_v36 = vmul.f32 -1.0, %v2305_v31  ;;  %1095 = vmatprep.mubr.bf16.mxu1 %v818_v25 }
 0x40f   :  { %v787_v59 = vpop.f32.mrf.mxu1 }
 0x410   :  { %v822_v1 = vpack.c.bf16 %v814_v36, %v813_v24  ;;  %v812_v63 = vmul.f32 -1.0, %v787_v59  ;;  %v992_v24 = vld [vmem:[#allocation8 + $0x100] sm:$0xff]  ;;  %v993_v36 = vld [vmem:[#allocation8 + $0x108] sm:$0xff] }
 0x411   :  { %v1024_v59 = vpack.c.bf16 %v993_v36, %v992_v24 }
 0x412   :  { %v821_v14 = vpack.c.bf16 %v812_v63, %v811_v2  ;;  %2306 = vmatprep.subr.bf16.mxu0 %v822_v1 }
 0x413   :  { %2307 = vmatpush3.bf16.msra.mxu0 %v822_v1 }
 0x414   :  { %2308 = vmatprep.subr.bf16.mxu0 %v821_v14 }
 0x415   :  { %1096 = vmatmul.mubr.bf16.gmra.mxu1 %v2961_v12 }
 0x416   :  { %1103 = vmatprep.mubr.bf16.mxu1 %v819_v41 }
 0x417   :  { %2309 = vmatpush3.bf16.msra.mxu0 %v821_v14 }
 0x418   :  { %2310 = vmatprep.subr.bf16.mxu0 %v820_v21 }
 0x41b   :  { %2311 = vmatpush3.bf16.msra.mxu0 %v820_v21 }
 0x41c   :  { %2312 = vmatprep.subr.bf16.mxu0 %v819_v41 }
 0x41d   :  { %1104 = vmatmul.mubr.bf16.gmra.mxu1 %v2942_v20  ;;  %v1003_v20 = vld [vmem:[#allocation8 + $0x158] sm:$0xff] }
 0x41e   :  { %1111 = vmatprep.mubr.bf16.mxu1 %v820_v21 }
 0x41f   :  { %2313 = vmatpush3.bf16.msra.mxu0 %v819_v41 }
 0x420   :  { %2314 = vmatprep.subr.bf16.mxu0 %v818_v25 }
 0x423   :  { %2315 = vmatpush3.bf16.msra.mxu0 %v818_v25  ;;  %v995_v25 = vld [vmem:[#allocation8 + $0x118] sm:$0xff] }
 0x424   :  { %2316 = vmatprep.subr.bf16.mxu0 %v817_v30  ;;  %v1025_v31 = vpack.c.bf16 %v995_v25, %v994_v58 }
 0x425   :  { %1112 = vmatmul.mubr.bf16.gmra.mxu1 %v2924_v32  ;;  %v1004_v32 = vld [vmem:[#allocation8 + $0x160] sm:$0xff] }
 0x426   :  { %1119 = vmatprep.mubr.bf16.mxu1 %v821_v14  ;;  %v1002_v14 = vld [vmem:[#allocation8 + $0x150] sm:$0xff] }
 0x427   :  { %2317 = vmatpush3.bf16.msra.mxu0 %v817_v30  ;;  %v1029_v12 = vpack.c.bf16 %v1003_v20, %v1002_v14  ;;  %v1027_v30 = vpack.c.bf16 %v999_v10, %v998_v15 }
 0x428   :  { %2318 = vmatprep.subr.bf16.mxu0 %v816_v18 }
 0x42b   :  { %2319 = vmatpush3.bf16.msra.mxu0 %v816_v18 }
 0x42c   :  { %2320 = vmatprep.subr.bf16.mxu0 %v815_v5 }
 0x42d   :  { %1120 = vmatmul.mubr.bf16.gmra.mxu1 %v2904_v54  ;;  %v1007_v54 = vld [vmem:[#allocation8 + $0x178] sm:$0xff] }
 0x42e   :  { %1127 = vmatprep.mubr.bf16.mxu1 %v822_v1  ;;  %v1031_v2 = vpack.c.bf16 %v1007_v54, %v1006_v48 }
 0x42f   :  { %2321 = vmatpush3.bf16.msra.mxu0 %v815_v5  ;;  %v1001_v5 = vld [vmem:[#allocation8 + $0x148] sm:$0xff] }
 0x430   :  { %2338 = vmatprep.subr.bf16.mxu0 %v1031_v2  ;;  %v1028_v18 = vpack.c.bf16 %v1001_v5, %v1000_v22 }
 0x432   :  { %2323 = vmatmul.mubr.bf16.vlgmr.msra.gmra.mxu0 %v2768_v38 }
 0x433   :  { %2326 = vmatprep.mubr.bf16.mxu0 %v2771_v39  ;;  %2339 = vmatpush3.bf16.msra.mxu0 %v1031_v2 }
 0x435   :  { %1128 = vmatmul.mubr.bf16.gmra.mxu1 %v2891_v35  ;;  %v1030_v35 = vpack.c.bf16 %v1005_v8, %v1004_v32 }
 0x436   :  { %2418 = vmatprep.mubr.bf16.mxu1 %v2716_v13 }
 0x437   :  { %2340 = vmatprep.subr.bf16.mxu0 %v1030_v35 }
 0x438   :  { %2341 = vmatpush3.bf16.msra.mxu0 %v1030_v35 }
 0x439   :  { %2342 = vmatprep.subr.bf16.mxu0 %v1029_v12 }
 0x43a   :  { %2327 = vmatmul.mubr.bf16.gmra.mxu0 %v2775_v56 }
 0x43b   :  { %2330 = vmatprep.mubr.bf16.mxu0 %v2777_v57 }
 0x43c   :  { %2343 = vmatpush3.bf16.msra.mxu0 %v1029_v12 }
 0x43d   :  { %2344 = vmatprep.subr.bf16.mxu0 %v1028_v18 }
 0x440   :  { %2345 = vmatpush3.bf16.msra.mxu0 %v1028_v18 }
 0x441   :  { %2346 = vmatprep.subr.bf16.mxu0 %v1027_v30 }
 0x442   :  { %2331 = vmatmul.mubr.bf16.gmra.mxu0 %v2781_v33 }
 0x443   :  { %2334 = vmatprep.mubr.bf16.mxu0 %v2783_v34 }
 0x444   :  { %2347 = vmatpush3.bf16.msra.mxu0 %v1027_v30 }
 0x445   :  { %2348 = vmatprep.subr.bf16.mxu0 %v1026_v6 }
 0x448   :  { %2349 = vmatpush3.bf16.msra.mxu0 %v1026_v6 }
 0x449   :  { %2350 = vmatprep.subr.bf16.mxu0 %v1025_v31 }
 0x44a   :  { %2335 = vmatmul.mubr.bf16.gmra.mxu0 %v2787_v40 }
 0x44c   :  { %2351 = vmatpush3.bf16.msra.mxu0 %v1025_v31 }
 0x44d   :  { %2352 = vmatprep.subr.bf16.mxu0 %v1024_v59 }
 0x450   :  { %2353 = vmatpush3.bf16.msra.mxu0 %v1024_v59 }
 0x4bd   :  { %v2002_v51 = vpop.f32.mrf.mxu1 }
 0x4bf   :  { %v2003_v1 = vpop.f32.mrf.mxu1 }
 0x4c0   :  { %v3032_v63 = vadd.f32 %v2003_v1, %v2002_v51 }
 0x4c1   :  { %v2005_v53 = vpop.f32.mrf.mxu1 }
 0x4c3   :  { %v2006_v19 = vpop.f32.mrf.mxu1 }
 0x4c4   :  { %v3034_v41 = vadd.f32 %v2006_v19, %v2005_v53 }
 0x4c5   :  { %v2008_v21 = vpop.f32.mrf.mxu1 }
 0x4c7   :  { %v2009_v48 = vpop.f32.mrf.mxu1 }
 0x4c8   :  { %v3036_v54 = vadd.f32 %v2009_v48, %v2008_v21 }
 0x4c9   :  { %v2011_v2 = vpop.f32.mrf.mxu1 }
 0x4cb   :  { %v2012_v32 = vpop.f32.mrf.mxu1 }
 0x4cc   :  { %v3038_v8 = vadd.f32 %v2012_v32, %v2011_v2  ;;  %v3369_v32 = vmax.f32 %v2884_v26, 0.0  ;;  %v3372_v26 = vmax.f32 %v2881_v37, 0.0 }
 0x4f2   :  { %v2324_v35 = vpop.f32.mrf.mxu0 }
 0x4f3   :  { %v922_v5 = vmul.f32 -2.0, %v2324_v35 }
 0x4f4   :  { %v857_v14 = vpop.f32.mrf.mxu0 }
 0x4f5   :  { %v920_v12 = vmul.f32 -2.0, %v857_v14  ;;  %v938_v6 = vsub.f32 %v922_v5, %v680_v55 }
 0x4f6   :  { %v2325_v20 = vpop.f32.mrf.mxu0 }
 0x4f7   :  { %v923_v22 = vmul.f32 -2.0, %v2325_v20  ;;  %v936_v47 = vsub.f32 %v920_v12, %v678_v62 }
 0x4f8   :  { %v860_v18 = vpop.f32.mrf.mxu0 }
 0x4f9   :  { %v921_v15 = vmul.f32 -2.0, %v860_v18  ;;  %v939_v10 = vsub.f32 %v923_v22, %v681_v29 }
 0x4fa   :  { %v2328_v30 = vpop.f32.mrf.mxu0 }
 0x4fb   :  { %v937_v52 = vsub.f32 %v921_v15, %v679_v46  ;;  %v953_v31 = vpack.c.bf16 %v939_v10, %v938_v6  ;;  %v926_v51 = vmul.f32 -2.0, %v2328_v30 }
 0x4fc   :  { %v873_v58 = vpop.f32.mrf.mxu0 }
 0x4fd   :  { %v952_v25 = vpack.c.bf16 %v937_v52, %v936_v47  ;;  %v924_v36 = vmul.f32 -2.0, %v873_v58  ;;  %v942_v55 = vsub.f32 %v926_v51, %v684_v17  ;;  %v3373_v52 = vmax.f32 %v2866_v7, 0.0 }
 0x4fe   :  { %v2329_v24 = vpop.f32.mrf.mxu0 }
 0x4ff   :  { %v927_v59 = vmul.f32 -2.0, %v2329_v24  ;;  %2354 = vmatprep.mubr.bf16.mxu0 %v952_v25  ;;  %v940_v42 = vsub.f32 %v924_v36, %v682_v60 }
 0x500   :  { %v876_v11 = vpop.f32.mrf.mxu0  ;;  %2355 = vmatmul.mubr.bf16.vlgmr.msra.gmra.mxu0 %v953_v31  ;;  %v3073_v31 = vpop.f32.mrf.mxu1 }
 0x501   :  { %v925_v29 = vmul.f32 -2.0, %v876_v11  ;;  %v943_v3 = vsub.f32 %v927_v59, %v685_v50 }
 0x502   :  { %v2332_v62 = vpop.f32.mrf.mxu0  ;;  %v3075_v24 = vpop.f32.mrf.mxu1 }
 0x503   :  { %v941_v49 = vsub.f32 %v925_v29, %v683_v23  ;;  %v955_v19 = vpack.c.bf16 %v943_v3, %v942_v55  ;;  %v930_v2 = vmul.f32 -2.0, %v2332_v62 }
 0x504   :  { %v889_v46 = vpop.f32.mrf.mxu0  ;;  %v3077_v44 = vpop.f32.mrf.mxu1 }
 0x505   :  { %v954_v1 = vpack.c.bf16 %v941_v49, %v940_v42  ;;  %v928_v21 = vmul.f32 -2.0, %v889_v46  ;;  %v946_v35 = vsub.f32 %v930_v2, %v3369_v32 }
 0x506   :  { %v2333_v53 = vpop.f32.mrf.mxu0  ;;  %v3079_v43 = vpop.f32.mrf.mxu1 }
 0x507   :  { %v931_v48 = vmul.f32 -2.0, %v2333_v53  ;;  %2358 = vmatprep.mubr.bf16.mxu0 %v954_v1  ;;  %v944_v23 = vsub.f32 %v928_v21, %v3367_v27 }
 0x508   :  { %v892_v9 = vpop.f32.mrf.mxu0  ;;  %2359 = vmatmul.mubr.bf16.gmra.mxu0 %v955_v19  ;;  %v3081_v36 = vpop.f32.mrf.mxu1 }
 0x509   :  { %v929_v50 = vmul.f32 -2.0, %v892_v9  ;;  %v947_v28 = vsub.f32 %v931_v48, %v689_v4 }
 0x50a   :  { %v2336_v60 = vpop.f32.mrf.mxu0  ;;  %v3083_v37 = vpop.f32.mrf.mxu1 }
 0x50b   :  { %v945_v17 = vsub.f32 %v929_v50, %v3368_v16  ;;  %v957_v22 = vpack.c.bf16 %v947_v28, %v946_v35  ;;  %v934_v15 = vmul.f32 -2.0, %v2336_v60 }
 0x50c   :  { %v905_v14 = vpop.f32.mrf.mxu0  ;;  %v2023_v7 = vpop.f32.mrf.mxu1 }
 0x50d   :  { %v956_v20 = vpack.c.bf16 %v945_v17, %v944_v23  ;;  %v932_v5 = vmul.f32 -2.0, %v905_v14  ;;  %v950_v6 = vsub.f32 %v934_v15, %v3373_v52 }
 0x50e   :  { %v2337_v12 = vpop.f32.mrf.mxu0  ;;  %v2024_v59 = vpop.f32.mrf.mxu1 }
 0x50f   :  { %v935_v18 = vmul.f32 -2.0, %v2337_v12  ;;  %2362 = vmatprep.mubr.bf16.mxu0 %v956_v20  ;;  %v948_v30 = vsub.f32 %v932_v5, %v3371_v0 }
 0x510   :  { %v908_v45 = vpop.f32.mrf.mxu0  ;;  %2363 = vmatmul.mubr.bf16.gmra.mxu0 %v957_v22  ;;  %v2026_v51 = vpop.f32.mrf.mxu1 }
 0x511   :  { %v933_v4 = vmul.f32 -2.0, %v908_v45  ;;  %v951_v10 = vsub.f32 %v935_v18, %v3370_v61  ;;  %v3100_v18 = vld [vmem:[%s3350_s5] ss:$0 sm:$0xff] }
 0x512   :  { %v2027_v11 = vpop.f32.mrf.mxu1 }
 0x513   :  { %v949_v47 = vsub.f32 %v933_v4, %v3372_v26  ;;  %v959_v25 = vpack.c.bf16 %v951_v10, %v950_v6 }
 0x514   :  { %v2029_v29 = vpop.f32.mrf.mxu1 }
 0x515   :  { %v958_v58 = vpack.c.bf16 %v949_v47, %v948_v30 }
 0x516   :  { %v2030_v3 = vpop.f32.mrf.mxu1 }
 0x517   :  { %2366 = vmatprep.mubr.bf16.mxu0 %v958_v58  ;;  %v2031_v52 = vadd.f32 %v2030_v3, %v2029_v29  ;;  %v2025_v3 = vadd.f32 %v2024_v59, %v2023_v7 }
 0x518   :  { %2367 = vmatmul.mubr.bf16.gmra.mxu0 %v959_v25  ;;  %v2032_v62 = vpop.f32.mrf.mxu1 }
 0x519   :  { %2386 = vmatprep.mubr.bf16.mxu0 %v2716_v13 }
 0x51a   :  { %v2033_v13 = vpop.f32.mrf.mxu1 }
 0x51b   :  { %v2034_v10 = vadd.f32 %v2033_v13, %v2032_v62 }
 0x51c   :  { %v2035_v42 = vpop.f32.mrf.mxu1 }
 0x51d   :  { %v1114_v62 = vadd.f32 %v2034_v10, %v3100_v18 }
 0x51e   :  { %v2036_v49 = vpop.f32.mrf.mxu1 }
 0x51f   :  { %v2037_v45 = vadd.f32 %v2036_v49, %v2035_v42  ;;  %v2028_v49 = vadd.f32 %v2027_v11, %v2026_v51 }
 0x520   :  { %v2038_v55 = vpop.f32.mrf.mxu1 }
 0x521   :  { %v1117_v58 = vadd.f32 %v2037_v45, %v3100_v18 }
 0x522   :  { %v2039_v46 = vpop.f32.mrf.mxu1 }
 0x523   :  { %v2040_v22 = vadd.f32 %v2039_v46, %v2038_v55 }
 0x524   :  { %v2041_v1 = vpop.f32.mrf.mxu1 }
 0x525   :  { %v1122_v26 = vadd.f32 %v2040_v22, %v3100_v18 }
 0x526   :  { %v2042_v21 = vpop.f32.mrf.mxu1 }
 0x527   :  { %v2043_v4 = vadd.f32 %v2042_v21, %v2041_v1 }
 0x528   :  { %v2044_v9 = vpop.f32.mrf.mxu1 }
 0x529   :  { %v1125_v42 = vadd.f32 %v2043_v4, %v3100_v18 }
 0x52a   :  { %v2045_v60 = vpop.f32.mrf.mxu1 }
 0x52b   :  { %v2046_v20 = vadd.f32 %v2045_v60, %v2044_v9  ;;  %v1109_v9 = vadd.f32 %v2031_v52, %v3100_v18  ;;  %v1077_v52 = vadd.f32 %v3034_v41, %v3100_v18 }
 0x52c   :  { %v2047_v16 = vpop.f32.mrf.mxu1 }
 0x52d   :  { %v1130_v61 = vadd.f32 %v2046_v20, %v3100_v18  ;;  %v2019_v20 = vadd.f32 %v3079_v43, %v3077_v44 }
 0x52e   :  { %v2048_v35 = vpop.f32.mrf.mxu1 }
 0x52f   :  { %v2049_v5 = vadd.f32 %v2048_v35, %v2047_v16  ;;  %v2022_v35 = vadd.f32 %v3083_v37, %v3081_v36  ;;  %v1101_v36 = vadd.f32 %v2025_v3, %v3100_v18  ;;  %v1093_v45 = vadd.f32 %v2019_v20, %v3100_v18  ;;  %v1529_v3 = vld [vmem:[#allocation10 + $0x70] sm:$0xff] }
 0x531   :  { %v1133_v47 = vadd.f32 %v2049_v5, %v3100_v18  ;;  %v1098_v5 = vadd.f32 %v2022_v35, %v3100_v18  ;;  %v1543_v35 = vld [vmem:[#allocation10 + $0xe0] sm:$0xff] }
 0x5c0   :  { %v3085_v53 = vpop.f32.mrf.mxu0 }
 0x5c2   :  { %v3087_v19 = vpop.f32.mrf.mxu0 }
 0x5c4   :  { %v3089_v48 = vpop.f32.mrf.mxu0 }
 0x5c6   :  { %v3091_v2 = vpop.f32.mrf.mxu0 }
 0x5c8   :  { %v2360_v50 = vpop.f32.mrf.mxu0 }
 0x5ca   :  { %v3093_v28 = vpop.f32.mrf.mxu0 }
 0x5cc   :  { %v2361_v27 = vpop.f32.mrf.mxu0 }
 0x5ce   :  { %v3095_v23 = vpop.f32.mrf.mxu0 }
 0x5cf   :  { %v3173_v4 = vadd.f32 %v3095_v23, %v1093_v45  ;;  %v1082_v23 = vadd.f32 %v3036_v54, %v3100_v18  ;;  %v1541_v45 = vld [vmem:[#allocation10 + $0xd0] sm:$0xff] }
 0x5d0   :  { %v2364_v17 = vpop.f32.mrf.mxu0 }
 0x5d1   :  { %v3121_v60 = vadd.f32 %v2364_v17, %v1114_v62  ;;  %v1546_v62 = vld [vmem:[#allocation10 + $0xf8] sm:$0xff] }
 0x5d2   :  { %v1202_v32 = vpop.f32.mrf.mxu0 }
 0x5d3   :  { %v3365_v37 = vmax.f32 %v3121_v60, 0.0 }
 0x5d4   :  { %v2365_v14 = vpop.f32.mrf.mxu0 }
 0x5d5   :  { %v3114_v46 = vadd.f32 %v2365_v14, %v1117_v58  ;;  %v1106_v14 = vadd.f32 %v2028_v49, %v3100_v18  ;;  %v3213_v58 = vadd.f32 %v3091_v2, %v1077_v52  ;;  %v1545_v49 = vld [vmem:[#allocation10 + $0xf0] sm:$0xff] }
 0x5d6   :  { %v1205_v12 = vpop.f32.mrf.mxu0  ;;  %v1525_v52 = vld [vmem:[#allocation10 + $0x50] sm:$0xff] }
 0x5d7   :  { %v1244_v7 = vmax.f32 %v3114_v46, 0.0  ;;  %v3135_v59 = vadd.f32 %v1205_v12, %v1109_v9  ;;  %v3149_v22 = vadd.f32 %v1202_v32, %v1106_v14  ;;  %v2016_v12 = vadd.f32 %v3075_v24, %v3073_v31  ;;  %v1530_v9 = vld [vmem:[#allocation10 + $0x78] sm:$0xff]  ;;  %v1544_v14 = vld [vmem:[#allocation10 + $0xe8] sm:$0xff] }
 0x5d8   :  { %v2368_v15 = vpop.f32.mrf.mxu0  ;;  %v3165_v32 = vadd.f32 %v2360_v50, %v1098_v5  ;;  %v1085_v50 = vadd.f32 %v3038_v8, %v3100_v18  ;;  %v1238_v8 = vmax.f32 %v3173_v4, 0.0  ;;  %v1234_v2 = vmax.f32 %v3213_v58, 0.0  ;;  %v1528_v5 = vld [vmem:[#allocation10 + $0x68] sm:$0xff] }
 0x5d9   :  { %v3103_v30 = vadd.f32 %v2368_v15, %v1130_v61  ;;  %v3155_v15 = vadd.f32 %v2361_v27, %v1101_v36  ;;  %v3161_v44 = vpack.c.bf16 %v1244_v7, %v3365_v37  ;;  %v3366_v43 = vmax.f32 %v3135_v59, 0.0 }
 0x5da   :  { %v1218_v0 = vpop.f32.mrf.mxu0  ;;  %v1241_v31 = vmax.f32 %v3149_v22, 0.0  ;;  %v1090_v24 = vadd.f32 %v2016_v12, %v3100_v18  ;;  %v1239_v10 = vmax.f32 %v3165_v32, 0.0  ;;  %v1570_v20 = vpack.c.bf16 %v1530_v9, %v1529_v3  ;;  %v1527_v12 = vld [vmem:[#allocation10 + $0x60] sm:$0xff] }
 0x5db   :  { %v3108_v25 = vadd.f32 %v1218_v0, %v1122_v26  ;;  %v3361_v1 = vmax.f32 %v3103_v30, 0.0  ;;  %v1240_v27 = vmax.f32 %v3155_v15, 0.0  ;;  %v3192_v26 = vadd.f32 %v3089_v48, %v1085_v50  ;;  %v1523_v9 = vld [vmem:[#allocation10 + $0x40] sm:$0xff] }
 0x5dc   :  { %v2369_v6 = vpop.f32.mrf.mxu0  ;;  %v3179_v61 = vpack.c.bf16 %v3366_v43, %v1241_v31  ;;  %v3186_v0 = vadd.f32 %v3093_v28, %v1090_v24  ;;  %v3203_v28 = vadd.f32 %v3085_v53, %v1082_v23  ;;  %v1074_v48 = vadd.f32 %v3032_v63, %v3100_v18  ;;  %v1542_v24 = vld [vmem:[#allocation10 + $0xd8] sm:$0xff] }
 0x5dd   :  { %v3110_v55 = vadd.f32 %v2369_v6, %v1133_v47  ;;  %v3363_v16 = vmax.f32 %v3108_v25, 0.0  ;;  %v3198_v47 = vpack.c.bf16 %v1240_v27, %v1239_v10  ;;  %v1236_v6 = vmax.f32 %v3192_v26, 0.0 }
 0x5de   :  { %v1221_v13 = vpop.f32.mrf.mxu0  ;;  %v1237_v54 = vmax.f32 %v3186_v0, 0.0  ;;  %v1235_v41 = vmax.f32 %v3203_v28, 0.0  ;;  %v1577_v36 = vpack.c.bf16 %v1544_v14, %v1543_v35  ;;  %v1569_v50 = vpack.c.bf16 %v1528_v5, %v1527_v12  ;;  %v1524_v35 = vld [vmem:[#allocation10 + $0x48] sm:$0xff]  ;;  %v1537_v14 = vld [vmem:[#allocation10 + $0xb0] sm:$0xff]  ;;  %v1522_v5 = vld [vmem:[#allocation10 + $0x38] sm:$0xff] }
 0x5df   :  { %v3364_v21 = vmax.f32 %v3110_v55, 0.0  ;;  %v3118_v29 = vadd.f32 %v1221_v13, %v1125_v42  ;;  %v3224_v42 = vadd.f32 %v3087_v19, %v1074_v48  ;;  %v1578_v13 = vpack.c.bf16 %v1546_v62, %v1545_v49  ;;  %v1526_v48 = vld [vmem:[#allocation10 + $0x58] sm:$0xff]  ;;  %v1539_v49 = vld [vmem:[#allocation10 + $0xc0] sm:$0xff]  ;;  %v1540_v62 = vld [vmem:[#allocation10 + $0xc8] sm:$0xff] }
 0x5e0   :  { %v3219_v53 = vpack.c.bf16 %v1238_v8, %v1237_v54  ;;  %v3231_v63 = vpack.c.bf16 %v1236_v6, %v1235_v41  ;;  %v1576_v23 = vpack.c.bf16 %v1542_v24, %v1541_v45  ;;  %v1568_v3 = vpack.c.bf16 %v1526_v48, %v1525_v52  ;;  %v1521_v12 = vld [vmem:[#allocation10 + $0x30] sm:$0xff]  ;;  %v1535_v24 = vld [vmem:[#allocation10 + $0xa0] sm:$0xff]  ;;  %v1520_v48 = vld [vmem:[#allocation10 + $0x28] sm:$0xff] }
 0x5e1   :  { %v3128_v51 = vpack.c.bf16 %v3364_v21, %v3361_v1  ;;  %v3362_v11 = vmax.f32 %v3118_v29, 0.0  ;;  %v1233_v18 = vmax.f32 %v3224_v42, 0.0  ;;  %v1538_v1 = vld [vmem:[#allocation10 + $0xb8] sm:$0xff]  ;;  %v1566_v45 = vpack.c.bf16 %v1522_v5, %v1521_v12  ;;  %v1519_v52 = vld [vmem:[#allocation10 + $0x20] sm:$0xff]  ;;  %v1516_v5 = vld [vmem:[#allocation10 + $0x8] sm:$0xff] }
 0x5e2   :  { %v1515_v12 = vld [vmem:[#allocation10] sm:$0xff]  ;;  %v3374_v32 = vmax.f32 %v3135_v59, 0.0  ;;  %v3376_v22 = vmax.f32 %v3110_v55, 0.0  ;;  %v3377_v59 = vmax.f32 %v3108_v25, 0.0 }
 0x5e3   :  { %v3141_v17 = vpack.c.bf16 %v3362_v11, %v3363_v16  ;;  %2370 = vmatprep.subr.bf16.mxu0 %v3128_v51  ;;  %v3241_v19 = vpack.c.bf16 %v1234_v2, %v1233_v18 }
 0x5e4   :  { %2371 = vmatpush3.bf16.msra.mxu0 %v3128_v51 }
 0x5e5   :  { %2372 = vmatprep.subr.bf16.mxu0 %v3141_v17 }
 0x5e8   :  { %2373 = vmatpush3.bf16.msra.mxu0 %v3141_v17 }
 0x5e9   :  { %2374 = vmatprep.subr.bf16.mxu0 %v3161_v44 }
 0x5ec   :  { %2375 = vmatpush3.bf16.msra.mxu0 %v3161_v44 }
 0x5ed   :  { %2376 = vmatprep.subr.bf16.mxu0 %v3179_v61 }
 0x5f0   :  { %2377 = vmatpush3.bf16.msra.mxu0 %v3179_v61 }
 0x5f1   :  { %2378 = vmatprep.subr.bf16.mxu0 %v3198_v47 }
 0x5f4   :  { %2379 = vmatpush3.bf16.msra.mxu0 %v3198_v47 }
 0x5f5   :  { %2380 = vmatprep.subr.bf16.mxu0 %v3219_v53 }
 0x5f8   :  { %2381 = vmatpush3.bf16.msra.mxu0 %v3219_v53 }
 0x5f9   :  { %2382 = vmatprep.subr.bf16.mxu0 %v3231_v63 }
 0x5fc   :  { %2383 = vmatpush3.bf16.msra.mxu0 %v3231_v63 }
 0x5fd   :  { %2384 = vmatprep.subr.bf16.mxu0 %v3241_v19 }
 0x600   :  { %2385 = vmatpush3.bf16.msra.mxu0 %v3241_v19 }
 0x601   :  { %2098 = vmatprep.subr.bf16.mxu0 %v1578_v13  ;;  %v1575_v13 = vpack.c.bf16 %v1540_v62, %v1539_v49  ;;  %v1565_v49 = vpack.c.bf16 %v1520_v48, %v1519_v52  ;;  %v1534_v62 = vld [vmem:[#allocation10 + $0x98] sm:$0xff] }
 0x603   :  { %2387 = vmatmul.mubr.bf16.vlgmr.msra.gmra.mxu0 %v2768_v38 }
 0x604   :  { %2390 = vmatprep.mubr.bf16.mxu0 %v2771_v39  ;;  %2099 = vmatpush3.bf16.msra.mxu0 %v1570_v20  ;;  %v1567_v20 = vpack.c.bf16 %v1524_v35, %v1523_v9  ;;  %v1518_v9 = vld [vmem:[#allocation10 + $0x18] sm:$0xff] }
 0x605   :  { %2100 = vmatprep.subr.bf16.mxu0 %v1577_v36  ;;  %v1574_v36 = vpack.c.bf16 %v1538_v1, %v1537_v14  ;;  %v1533_v1 = vld [vmem:[#allocation10 + $0x90] sm:$0xff]  ;;  %v1531_v14 = vld [vmem:[#allocation10 + $0x80] sm:$0xff] }
 0x608   :  { %2101 = vmatpush3.bf16.msra.mxu0 %v1569_v50  ;;  %v1536_v50 = vld [vmem:[#allocation10 + $0xa8] sm:$0xff] }
 0x609   :  { %2102 = vmatprep.subr.bf16.mxu0 %v1576_v23  ;;  %v1573_v23 = vpack.c.bf16 %v1536_v50, %v1535_v24 }
 0x60b   :  { %2391 = vmatmul.mubr.bf16.gmra.mxu0 %v2775_v56 }
 0x60c   :  { %2394 = vmatprep.mubr.bf16.mxu0 %v2777_v57  ;;  %2103 = vmatpush3.bf16.msra.mxu0 %v1568_v3  ;;  %v1572_v3 = vpack.c.bf16 %v1534_v62, %v1533_v1 }
 0x60d   :  { %2104 = vmatprep.subr.bf16.mxu0 %v1575_v13  ;;  %v1517_v13 = vld [vmem:[#allocation10 + $0x10] sm:$0xff] }
 0x60e   :  { %v1564_v35 = vpack.c.bf16 %v1518_v9, %v1517_v13 }
 0x610   :  { %2105 = vmatpush3.bf16.msra.mxu0 %v1567_v20  ;;  %v1532_v20 = vld [vmem:[#allocation10 + $0x88] sm:$0xff] }
 0x611   :  { %2106 = vmatprep.subr.bf16.mxu0 %v1574_v36  ;;  %v1571_v36 = vpack.c.bf16 %v1532_v20, %v1531_v14 }
 0x613   :  { %2395 = vmatmul.mubr.bf16.gmra.mxu0 %v2781_v33 }
 0x614   :  { %2398 = vmatprep.mubr.bf16.mxu0 %v2783_v34  ;;  %2107 = vmatpush3.bf16.msra.mxu0 %v1566_v45  ;;  %v1563_v45 = vpack.c.bf16 %v1516_v5, %v1515_v12 }
 0x615   :  { %2108 = vmatprep.subr.bf16.mxu0 %v1573_v23 }
 0x618   :  { %2109 = vmatpush3.bf16.msra.mxu0 %v1565_v49 }
 0x619   :  { %2110 = vmatprep.subr.bf16.mxu0 %v1572_v3 }
 0x61b   :  { %2399 = vmatmul.mubr.bf16.gmra.mxu0 %v2787_v40 }
 0x61c   :  { %2111 = vmatpush3.bf16.msra.mxu0 %v1564_v35 }
 0x61d   :  { %2112 = vmatprep.subr.bf16.mxu0 %v1571_v36 }
 0x620   :  { %2113 = vmatpush3.bf16.msra.mxu0 %v1563_v45 }
 0x6c3   :  { %v2388_v24 = vpop.f32.mrf.mxu0 }
 0x6c4   :  { %v1356_v11 = vmul.f32 -1.0, %v2388_v24 }
 0x6c5   :  { %v1291_v50 = vpop.f32.mrf.mxu0 }
 0x6c6   :  { %v1354_v48 = vmul.f32 -1.0, %v1291_v50 }
 0x6c7   :  { %v2389_v23 = vpop.f32.mrf.mxu0 }
 0x6c8   :  { %v1357_v49 = vmul.f32 -1.0, %v2389_v23 }
 0x6c9   :  { %v1294_v52 = vpop.f32.mrf.mxu0 }
 0x6ca   :  { %v1355_v1 = vmul.f32 -1.0, %v1294_v52  ;;  %v1371_v9 = vpack.c.bf16 %v1357_v49, %v1356_v11 }
 0x6cb   :  { %v2392_v62 = vpop.f32.mrf.mxu0 }
 0x6cc   :  { %v1370_v13 = vpack.c.bf16 %v1355_v1, %v1354_v48  ;;  %v1360_v52 = vmul.f32 -1.0, %v2392_v62 }
 0x6cd   :  { %v1307_v3 = vpop.f32.mrf.mxu0 }
 0x6ce   :  { %1626 = vmatprep.mubr.bf16.mxu0 %v1370_v13  ;;  %v1358_v12 = vmul.f32 -1.0, %v1307_v3 }
 0x6cf   :  { %v2393_v35 = vpop.f32.mrf.mxu0  ;;  %1627 = vmatmul.mubr.bf16.vlgmr.msra.gmra.mxu0 %v3241_v19 }
 0x6d0   :  { %1634 = vmatprep.mubr.bf16.mxu0 %v1371_v9  ;;  %v1361_v24 = vmul.f32 -1.0, %v2393_v35 }
 0x6d1   :  { %v1310_v14 = vpop.f32.mrf.mxu0 }
 0x6d2   :  { %v1359_v20 = vmul.f32 -1.0, %v1310_v14  ;;  %v1373_v48 = vpack.c.bf16 %v1361_v24, %v1360_v52 }
 0x6d3   :  { %v2396_v36 = vpop.f32.mrf.mxu0 }
 0x6d4   :  { %v1372_v45 = vpack.c.bf16 %v1359_v20, %v1358_v12  ;;  %v1364_v35 = vmul.f32 -1.0, %v2396_v36  ;;  %v1550_v36 = vld [vmem:[#allocation10 + $0x118] sm:$0xff] }
 0x6d5   :  { %v1323_v5 = vpop.f32.mrf.mxu0 }
 0x6d6   :  { %v1362_v37 = vmul.f32 -1.0, %v1323_v5 }
 0x6d7   :  { %v2397_v16 = vpop.f32.mrf.mxu0  ;;  %1635 = vmatmul.mubr.bf16.gmra.mxu0 %v3231_v63 }
 0x6d8   :  { %1642 = vmatprep.mubr.bf16.mxu0 %v1372_v45  ;;  %v1365_v63 = vmul.f32 -1.0, %v2397_v16  ;;  %v1562_v16 = vld [vmem:[#allocation10 + $0x178] sm:$0xff] }
 0x6d9   :  { %v1326_v50 = vpop.f32.mrf.mxu0 }
 0x6da   :  { %v1363_v3 = vmul.f32 -1.0, %v1326_v50  ;;  %v1375_v24 = vpack.c.bf16 %v1365_v63, %v1364_v35  ;;  %v1548_v50 = vld [vmem:[#allocation10 + $0x108] sm:$0xff] }
 0x6db   :  { %v2400_v23 = vpop.f32.mrf.mxu0 }
 0x6dc   :  { %v1368_v19 = vmul.f32 -1.0, %v2400_v23  ;;  %v1374_v62 = vpack.c.bf16 %v1363_v3, %v1362_v37  ;;  %v1560_v37 = vld [vmem:[#allocation10 + $0x168] sm:$0xff] }
 0x6dd   :  { %v1339_v11 = vpop.f32.mrf.mxu0 }
 0x6de   :  { %v1366_v21 = vmul.f32 -1.0, %v1339_v11 }
 0x6df   :  { %v2401_v49 = vpop.f32.mrf.mxu0  ;;  %1643 = vmatmul.mubr.bf16.gmra.mxu0 %v3219_v53  ;;  %v1552_v53 = vld [vmem:[#allocation10 + $0x128] sm:$0xff] }
 0x6e0   :  { %v1369_v1 = vmul.f32 -1.0, %v2401_v49  ;;  %1650 = vmatprep.mubr.bf16.mxu0 %v1373_v48 }
 0x6e1   :  { %v1342_v14 = vpop.f32.mrf.mxu0 }
 0x6e2   :  { %v1377_v20 = vpack.c.bf16 %v1369_v1, %v1368_v19  ;;  %v1367_v12 = vmul.f32 -1.0, %v1342_v14 }
 0x6e4   :  { %v1376_v43 = vpack.c.bf16 %v1367_v12, %v1366_v21  ;;  %2402 = vmatprep.subr.bf16.mxu1 %v1377_v20  ;;  %v1561_v21 = vld [vmem:[#allocation10 + $0x170] sm:$0xff] }
 0x6e5   :  { %2403 = vmatpush3.bf16.msra.mxu1 %v1377_v20 }
 0x6e6   :  { %2404 = vmatprep.subr.bf16.mxu1 %v1376_v43 }
 0x6e7   :  { %1651 = vmatmul.mubr.bf16.gmra.mxu0 %v3198_v47  ;;  %v1551_v47 = vld [vmem:[#allocation10 + $0x120] sm:$0xff] }
 0x6e8   :  { %1658 = vmatprep.mubr.bf16.mxu0 %v1374_v62 }
 0x6e9   :  { %2405 = vmatpush3.bf16.msra.mxu1 %v1376_v43 }
 0x6ea   :  { %2406 = vmatprep.subr.bf16.mxu1 %v1375_v24 }
 0x6ed   :  { %2407 = vmatpush3.bf16.msra.mxu1 %v1375_v24 }
 0x6ee   :  { %2408 = vmatprep.subr.bf16.mxu1 %v1374_v62 }
 0x6ef   :  { %1659 = vmatmul.mubr.bf16.gmra.mxu0 %v3179_v61 }
 0x6f0   :  { %1666 = vmatprep.mubr.bf16.mxu0 %v1375_v24 }
 0x6f1   :  { %2409 = vmatpush3.bf16.msra.mxu1 %v1374_v62 }
 0x6f2   :  { %2410 = vmatprep.subr.bf16.mxu1 %v1373_v48 }
 0x6f5   :  { %2411 = vmatpush3.bf16.msra.mxu1 %v1373_v48 }
 0x6f6   :  { %2412 = vmatprep.subr.bf16.mxu1 %v1372_v45 }
 0x6f7   :  { %1667 = vmatmul.mubr.bf16.gmra.mxu0 %v3161_v44 }
 0x6f8   :  { %1674 = vmatprep.mubr.bf16.mxu0 %v1376_v43  ;;  %v1554_v43 = vld [vmem:[#allocation10 + $0x138] sm:$0xff] }
 0x6f9   :  { %2413 = vmatpush3.bf16.msra.mxu1 %v1372_v45  ;;  %v1547_v45 = vld [vmem:[#allocation10 + $0x100] sm:$0xff] }
 0x6fa   :  { %2414 = vmatprep.subr.bf16.mxu1 %v1371_v9  ;;  %v1579_v23 = vpack.c.bf16 %v1548_v50, %v1547_v45  ;;  %v3379_v50 = vmax.f32 %v3103_v30, 0.0 }
 0x6fd   :  { %2415 = vmatpush3.bf16.msra.mxu1 %v1371_v9  ;;  %v1549_v9 = vld [vmem:[#allocation10 + $0x110] sm:$0xff] }
 0x6fe   :  { %2416 = vmatprep.subr.bf16.mxu1 %v1370_v13  ;;  %v1580_v5 = vpack.c.bf16 %v1550_v36, %v1549_v9 }
 0x6ff   :  { %1675 = vmatmul.mubr.bf16.gmra.mxu0 %v3141_v17  ;;  %v1586_v17 = vpack.c.bf16 %v1562_v16, %v1561_v21 }
 0x700   :  { %1682 = vmatprep.mubr.bf16.mxu0 %v1377_v20 }
 0x701   :  { %2417 = vmatpush3.bf16.msra.mxu1 %v1370_v13  ;;  %v1581_v13 = vpack.c.bf16 %v1552_v53, %v1551_v47 }
 0x702   :  { %2434 = vmatprep.subr.bf16.mxu1 %v1586_v17 }
 0x704   :  { %2419 = vmatmul.mubr.bf16.vlgmr.msra.gmra.mxu1 %v2768_v38  ;;  %v1559_v38 = vld [vmem:[#allocation10 + $0x160] sm:$0xff] }
 0x705   :  { %2422 = vmatprep.mubr.bf16.mxu1 %v2771_v39  ;;  %2435 = vmatpush3.bf16.msra.mxu1 %v1586_v17  ;;  %v1585_v39 = vpack.c.bf16 %v1560_v37, %v1559_v38 }
 0x707   :  { %1683 = vmatmul.mubr.bf16.gmra.mxu0 %v3128_v51  ;;  %2436 = vmatprep.subr.bf16.mxu1 %v1585_v39  ;;  %v1557_v51 = vld [vmem:[#allocation10 + $0x150] sm:$0xff] }
 0x709   :  { %2437 = vmatpush3.bf16.msra.mxu1 %v1585_v39 }
 0x70c   :  { %2423 = vmatmul.mubr.bf16.gmra.mxu1 %v2775_v56  ;;  %v1558_v56 = vld [vmem:[#allocation10 + $0x158] sm:$0xff] }
 0x70d   :  { %2426 = vmatprep.mubr.bf16.mxu1 %v2777_v57  ;;  %v1584_v44 = vpack.c.bf16 %v1558_v56, %v1557_v51  ;;  %v1555_v57 = vld [vmem:[#allocation10 + $0x140] sm:$0xff] }
 0x70f   :  { %2438 = vmatprep.subr.bf16.mxu1 %v1584_v44 }
 0x710   :  { %2439 = vmatpush3.bf16.msra.mxu1 %v1584_v44 }
 0x714   :  { %2427 = vmatmul.mubr.bf16.gmra.mxu1 %v2781_v33  ;;  %v1556_v33 = vld [vmem:[#allocation10 + $0x148] sm:$0xff] }
 0x715   :  { %2430 = vmatprep.mubr.bf16.mxu1 %v2783_v34  ;;  %v1583_v34 = vpack.c.bf16 %v1556_v33, %v1555_v57 }
 0x717   :  { %2440 = vmatprep.subr.bf16.mxu1 %v1583_v34 }
 0x718   :  { %2441 = vmatpush3.bf16.msra.mxu1 %v1583_v34 }
 0x71c   :  { %2431 = vmatmul.mubr.bf16.gmra.mxu1 %v2787_v40  ;;  %v1553_v40 = vld [vmem:[#allocation10 + $0x130] sm:$0xff] }
 0x71d   :  { %v1582_v61 = vpack.c.bf16 %v1554_v43, %v1553_v40 }
 0x71f   :  { %2442 = vmatprep.subr.bf16.mxu1 %v1582_v61 }
 0x720   :  { %2443 = vmatpush3.bf16.msra.mxu1 %v1582_v61 }
 0x721   :  { %2444 = vmatprep.subr.bf16.mxu1 %v1581_v13 }
 0x724   :  { %2445 = vmatpush3.bf16.msra.mxu1 %v1581_v13 }
 0x725   :  { %2446 = vmatprep.subr.bf16.mxu1 %v1580_v5 }
 0x728   :  { %2447 = vmatpush3.bf16.msra.mxu1 %v1580_v5 }
 0x729   :  { %2448 = vmatprep.subr.bf16.mxu1 %v1579_v23 }
 0x72c   :  { %2449 = vmatpush3.bf16.msra.mxu1 %v1579_v23 }
 0x7c4   :  { %v2420_v52 = vpop.f32.mrf.mxu1 }
 0x7c5   :  { %v1477_v1 = vmul.f32 -2.0, %v2420_v52 }
 0x7c6   :  { %v1412_v11 = vpop.f32.mrf.mxu1 }
 0x7c7   :  { %v1475_v49 = vmul.f32 -2.0, %v1412_v11  ;;  %v1493_v62 = vsub.f32 %v1477_v1, %v1235_v41 }
 0x7c8   :  { %v2421_v48 = vpop.f32.mrf.mxu1 }
 0x7c9   :  { %v1478_v19 = vmul.f32 -2.0, %v2421_v48  ;;  %v1491_v63 = vsub.f32 %v1475_v49, %v1233_v18  ;;  %v2114_v48 = vpop.f32.mrf.mxu0 }
 0x7ca   :  { %v1415_v14 = vpop.f32.mrf.mxu1 }
 0x7cb   :  { %v1476_v3 = vmul.f32 -2.0, %v1415_v14  ;;  %v1494_v20 = vsub.f32 %v1478_v19, %v1236_v6  ;;  %v2115_v49 = vpop.f32.mrf.mxu0 }
 0x7cc   :  { %v2424_v12 = vpop.f32.mrf.mxu1 }
 0x7cd   :  { %v1492_v35 = vsub.f32 %v1476_v3, %v1234_v2  ;;  %v1508_v16 = vpack.c.bf16 %v1494_v20, %v1493_v62  ;;  %v1481_v39 = vmul.f32 -2.0, %v2424_v12  ;;  %v2117_v19 = vpop.f32.mrf.mxu0 }
 0x7ce   :  { %v1428_v24 = vpop.f32.mrf.mxu1 }
 0x7cf   :  { %v1507_v21 = vpack.c.bf16 %v1492_v35, %v1491_v63  ;;  %v1479_v38 = vmul.f32 -2.0, %v1428_v24  ;;  %v1497_v41 = vsub.f32 %v1481_v39, %v1239_v10  ;;  %v2118_v1 = vpop.f32.mrf.mxu0 }
 0x7d0   :  { %v2425_v17 = vpop.f32.mrf.mxu1 }
 0x7d1   :  { %v1482_v37 = vmul.f32 -2.0, %v2425_v17  ;;  %2450 = vmatprep.mubr.bf16.mxu1 %v1507_v21  ;;  %v1495_v58 = vsub.f32 %v1479_v38, %v1237_v54  ;;  %v2120_v14 = vpop.f32.mrf.mxu0 }
 0x7d2   :  { %v1431_v26 = vpop.f32.mrf.mxu1  ;;  %2451 = vmatmul.mubr.bf16.vlgmr.msra.gmra.mxu1 %v1508_v16 }
 0x7d3   :  { %v1480_v6 = vmul.f32 -2.0, %v1431_v26  ;;  %v1498_v42 = vsub.f32 %v1482_v37, %v1240_v27  ;;  %v2121_v55 = vpop.f32.mrf.mxu0 }
 0x7d4   :  { %v2428_v18 = vpop.f32.mrf.mxu1 }
 0x7d5   :  { %v1496_v28 = vsub.f32 %v1480_v6, %v1238_v8  ;;  %v1510_v44 = vpack.c.bf16 %v1498_v42, %v1497_v41  ;;  %v1485_v34 = vmul.f32 -2.0, %v2428_v18  ;;  %v3375_v8 = vmax.f32 %v3121_v60, 0.0  ;;  %v2123_v3 = vpop.f32.mrf.mxu0  ;;  %v3311_v41 = vld [vmem:[%s3352_s7] ss:$0 sm:$0xff]  ;;  %s2609_s7 = smov [#allocation11]  }
 0x7d6   :  { %v1444_v2 = vpop.f32.mrf.mxu1  ;;  %v3378_v60 = vmax.f32 %v3118_v29, 0.0  ;;  %v2122_v18 = vadd.f32 %v2121_v55, %v2120_v14  ;;  %s1825_s9 = sshll.u32 %s2609_s7, 4  ;;  %s1826_s9 = int_to_ptr.vmem [resolvable:$true] %s1825_s9 }
 0x7d7   :  { %v1509_v51 = vpack.c.bf16 %v1496_v28, %v1495_v58  ;;  %v1483_v57 = vmul.f32 -2.0, %v1444_v2  ;;  %v1501_v40 = vsub.f32 %v1485_v34, %v3375_v8  ;;  %v2124_v20 = vpop.f32.mrf.mxu0  ;;  %v2116_v28 = vadd.f32 %v2115_v49, %v2114_v48  ;;  %s2574_s12 = scalar_lea.vmem %s1826_s9, 2048  ;;  %p2579_p12 = scmp.lt.s32.totalorder %s1826_s9, %s1826_s9 }
 0x7d8   :  { %v2429_v56 = vpop.f32.mrf.mxu1  ;;  %v2125_v2 = vadd.f32 %v2124_v20, %v2123_v3  ;;  %p2575_p11 = scmp.ne.s32.totalorder %s1826_s9, %s2574_s12  ;;  %p2580_p13 = scmp.lt.s32.totalorder %s2574_s12, %s2574_s12 }
 0x7d9   :  { %v1486_v33 = vmul.f32 -2.0, %v2429_v56  ;;  %2454 = vmatprep.mubr.bf16.mxu1 %v1509_v51  ;;  %v1499_v4 = vsub.f32 %v1483_v57, %v1241_v31  ;;  %v2126_v25 = vpop.f32.mrf.mxu0  ;;  %v1637_v51 = vadd.f32 %v2122_v18, %v3311_v41  ;;  %v2119_v57 = vadd.f32 %v2118_v1, %v2117_v19 }
 0x7da   :  { %v1447_v15 = vpop.f32.mrf.mxu1  ;;  %2455 = vmatmul.mubr.bf16.gmra.mxu1 %v1510_v44  ;;  %v1629_v34 = vadd.f32 %v2116_v28, %v3311_v41  ;;  %p2581_p0 = por %p2580_p13, %p2579_p12 }
 0x7db   :  { %v1484_v27 = vmul.f32 -2.0, %v1447_v15  ;;  %v1502_v0 = vsub.f32 %v1486_v33, %v1244_v7  ;;  %v2127_v12 = vpop.f32.mrf.mxu0 }
 0x7dc   :  { %v2432_v54 = vpop.f32.mrf.mxu1  ;;  %v2128_v8 = vadd.f32 %v2127_v12, %v2126_v25  ;;  %p2582_p1 = pnand %p2581_p0, %p2575_p11 }
 0x7dd   :  { %v1500_v10 = vsub.f32 %v1484_v27, %v3374_v32  ;;  %v1512_v53 = vpack.c.bf16 %v1502_v0, %v1501_v40  ;;  %v1489_v36 = vmul.f32 -2.0, %v2432_v54  ;;  %v2129_v63 = vpop.f32.mrf.mxu0 }
 0x7de   :  { %v1460_v43 = vpop.f32.mrf.mxu1 }
 0x7df   :  { %v1511_v61 = vpack.c.bf16 %v1500_v10, %v1499_v4  ;;  %v1487_v13 = vmul.f32 -2.0, %v1460_v43  ;;  %v1505_v23 = vsub.f32 %v1489_v36, %v3379_v50  ;;  %v2130_v29 = vpop.f32.mrf.mxu0  ;;  %v1640_v4 = vadd.f32 %v2125_v2, %v3311_v41 }
 0x7e0   :  { %v2433_v47 = vpop.f32.mrf.mxu1 }
 0x7e1   :  { %v1490_v9 = vmul.f32 -2.0, %v2433_v47  ;;  %2458 = vmatprep.mubr.bf16.mxu1 %v1511_v61  ;;  %v1503_v5 = vsub.f32 %v1487_v13, %v3377_v59  ;;  %v2132_v35 = vpop.f32.mrf.mxu0  ;;  %v1632_v61 = vadd.f32 %v2119_v57, %v3311_v41 }
 0x7e2   :  { %v1463_v46 = vpop.f32.mrf.mxu1  ;;  %2459 = vmatmul.mubr.bf16.gmra.mxu1 %v1512_v53 }
 0x7e3   :  { %v1488_v7 = vmul.f32 -2.0, %v1463_v46  ;;  %v1506_v31 = vsub.f32 %v1490_v9, %v3376_v22  ;;  %v2133_v62 = vpop.f32.mrf.mxu0  ;;  %v2131_v22 = vadd.f32 %v2130_v29, %v2129_v63 }
 0x7e4   :  { %v2134_v27 = vadd.f32 %v2133_v62, %v2132_v35 }
 0x7e5   :  { %v1504_v45 = vsub.f32 %v1488_v7, %v3378_v60  ;;  %v1514_v11 = vpack.c.bf16 %v1506_v31, %v1505_v23  ;;  %v2135_v30 = vpop.f32.mrf.mxu0  ;;  %v1648_v14 = vadd.f32 %v2131_v22, %v3311_v41 }
 0x7e6   :  { %v1653_v36 = vadd.f32 %v2134_v27, %v3311_v41 }
 0x7e7   :  { %v1513_v52 = vpack.c.bf16 %v1504_v45, %v1503_v5  ;;  %v2136_v24 = vpop.f32.mrf.mxu0  ;;  %v1645_v5 = vadd.f32 %v2128_v8, %v3311_v41 }
 0x7e8   :  { %v2137_v53 = vadd.f32 %v2136_v24, %v2135_v30 }
 0x7e9   :  { %2462 = vmatprep.mubr.bf16.mxu1 %v1513_v52  ;;  %v2138_v21 = vpop.f32.mrf.mxu0 }
 0x7ea   :  { %2463 = vmatmul.mubr.bf16.gmra.mxu1 %v1514_v11  ;;  %v1656_v52 = vadd.f32 %v2137_v53, %v3311_v41 }
 0x7eb   :  { %v2139_v16 = vpop.f32.mrf.mxu0 }
 0x7ec   :  { %v2140_v49 = vadd.f32 %v2139_v16, %v2138_v21 }
 0x7ed   :  { %v3300_v17 = vpop.f32.mrf.mxu0 }
 0x7ee   :  { %v1661_v24 = vadd.f32 %v2140_v49, %v3311_v41 }
 0x7ef   :  { %v3302_v38 = vpop.f32.mrf.mxu0 }
 0x7f0   :  { %v2143_v35 = vadd.f32 %v3302_v38, %v3300_v17 }
 0x7f1   :  { %v2144_v37 = vpop.f32.mrf.mxu0 }
 0x7f2   :  { %v1664_v38 = vadd.f32 %v2143_v35, %v3311_v41 }
 0x7f3   :  { %v2145_v39 = vpop.f32.mrf.mxu0 }
 0x7f4   :  { %v2146_v45 = vadd.f32 %v2145_v39, %v2144_v37 }
 0x7f5   :  { %v2147_v26 = vpop.f32.mrf.mxu0 }
 0x7f6   :  { %v1669_v12 = vadd.f32 %v2146_v45, %v3311_v41 }
 0x7f7   :  { %v2148_v6 = vpop.f32.mrf.mxu0 }
 0x7f8   :  { %v2149_v3 = vadd.f32 %v2148_v6, %v2147_v26 }
 0x7f9   :  { %v3304_v42 = vpop.f32.mrf.mxu0 }
 0x7fa   :  { %v1672_v26 = vadd.f32 %v2149_v3, %v3311_v41 }
 0x7fb   :  { %v3306_v58 = vpop.f32.mrf.mxu0 }
 0x7fc   :  { %v2152_v28 = vadd.f32 %v3306_v58, %v3304_v42 }
 0x7fd   :  { %v3314_v56 = vpop.f32.mrf.mxu0 }
 0x7fe   :  { %v1677_v42 = vadd.f32 %v2152_v28, %v3311_v41 }
 0x7ff   :  { %v3318_v32 = vpop.f32.mrf.mxu0 }
 0x800   :  { %v2155_v27 = vadd.f32 %v3318_v32, %v3314_v56 }
 0x801   :  { %v2156_v46 = vpop.f32.mrf.mxu0 }
 0x803   :  { %v2157_v11 = vpop.f32.mrf.mxu0 }
 0x804   :  { %v2158_v16 = vadd.f32 %v2157_v11, %v2156_v46 }
 0x805   :  { %v2159_v63 = vpop.f32.mrf.mxu0 }
 0x807   :  { %v2160_v6 = vpop.f32.mrf.mxu0 }
 0x892   :  { %v2452_v44 = vpop.f32.mrf.mxu1 }
 0x893   :  { %v1734_v33 = vadd.f32 %v2452_v44, %v1637_v51  ;;  %v2161_v44 = vadd.f32 %v2160_v6, %v2159_v63 }
 0x894   :  { %v1725_v15 = vpop.f32.mrf.mxu1 }
 0x895   :  { %v1790_v0 = vmax.f32 %v1734_v33, 0.0  ;;  %v1726_v54 = vadd.f32 %v1725_v15, %v1629_v34  ;;  %v1685_v34 = vadd.f32 %v2158_v16, %v3311_v41  ;;  %v1688_v8 = vadd.f32 %v2161_v44, %v3311_v41 }
 0x896   :  { %v2453_v10 = vpop.f32.mrf.mxu1 }
 0x897   :  { %1806 = vst [vmem:[#allocation11 + $0x10] sm:$0xff] %v1790_v0  ;;  %v1788_v40 = vmax.f32 %v1726_v54, 0.0  ;;  %v1737_v43 = vadd.f32 %v2453_v10, %v1640_v4 }
 0x898   :  { %v1728_v47 = vpop.f32.mrf.mxu1 }
 0x899   :  { %1804 = vst [vmem:[#allocation11] sm:$0xff] %v1788_v40  ;;  %v1791_v13 = vmax.f32 %v1737_v43, 0.0  ;;  %v1729_v9 = vadd.f32 %v1728_v47, %v1632_v61  ;;  %v1680_v47 = vadd.f32 %v2155_v27, %v3311_v41 }
 0x89a   :  { %v2456_v7 = vpop.f32.mrf.mxu1 }
 0x89b   :  { %1807 = vst [vmem:[#allocation11 + $0x18] sm:$0xff] %v1791_v13  ;;  %v1789_v31 = vmax.f32 %v1729_v9, 0.0  ;;  %v1750_v59 = vadd.f32 %v2456_v7, %v1653_v36 }
 0x89c   :  { %v1741_v60 = vpop.f32.mrf.mxu1 }
 0x89d   :  { %1805 = vst [vmem:[#allocation11 + $0x8] sm:$0xff] %v1789_v31  ;;  %v1794_v50 = vmax.f32 %v1750_v59, 0.0  ;;  %v1742_v23 = vadd.f32 %v1741_v60, %v1645_v5 }
 0x89e   :  { %v2457_v48 = vpop.f32.mrf.mxu1 }
 0x89f   :  { %1810 = vst [vmem:[#allocation11 + $0x30] sm:$0xff] %v1794_v50  ;;  %v1792_v19 = vmax.f32 %v1742_v23, 0.0  ;;  %v1753_v1 = vadd.f32 %v2457_v48, %v1656_v52 }
 0x8a0   :  { %v1744_v55 = vpop.f32.mrf.mxu1 }
 0x8a1   :  { %1808 = vst [vmem:[#allocation11 + $0x20] sm:$0xff] %v1792_v19  ;;  %v1795_v20 = vmax.f32 %v1753_v1, 0.0  ;;  %v1745_v25 = vadd.f32 %v1744_v55, %v1648_v14 }
 0x8a2   :  { %v2460_v29 = vpop.f32.mrf.mxu1 }
 0x8a3   :  { %1811 = vst [vmem:[#allocation11 + $0x38] sm:$0xff] %v1795_v20  ;;  %v1793_v62 = vmax.f32 %v1745_v25, 0.0  ;;  %v1766_v30 = vadd.f32 %v2460_v29, %v1669_v12 }
 0x8a4   :  { %v1757_v21 = vpop.f32.mrf.mxu1 }
 0x8a5   :  { %1809 = vst [vmem:[#allocation11 + $0x28] sm:$0xff] %v1793_v62  ;;  %v1798_v37 = vmax.f32 %v1766_v30, 0.0  ;;  %v1758_v39 = vadd.f32 %v1757_v21, %v1661_v24 }
 0x8a6   :  { %v2461_v18 = vpop.f32.mrf.mxu1 }
 0x8a7   :  { %1814 = vst [vmem:[#allocation11 + $0x50] sm:$0xff] %v1798_v37  ;;  %v1796_v2 = vmax.f32 %v1758_v39, 0.0  ;;  %v1769_v17 = vadd.f32 %v2461_v18, %v1672_v26 }
 0x8a8   :  { %v1760_v51 = vpop.f32.mrf.mxu1 }
 0x8a9   :  { %1812 = vst [vmem:[#allocation11 + $0x40] sm:$0xff] %v1796_v2  ;;  %v1799_v57 = vmax.f32 %v1769_v17, 0.0  ;;  %v1761_v33 = vadd.f32 %v1760_v51, %v1664_v38 }
 0x8aa   :  { %v2464_v15 = vpop.f32.mrf.mxu1 }
 0x8ab   :  { %1815 = vst [vmem:[#allocation11 + $0x58] sm:$0xff] %v1799_v57  ;;  %v1797_v0 = vmax.f32 %v1761_v33, 0.0  ;;  %v1782_v54 = vadd.f32 %v2464_v15, %v1685_v34 }
 0x8ac   :  { %v1773_v58 = vpop.f32.mrf.mxu1 }
 0x8ad   :  { %1813 = vst [vmem:[#allocation11 + $0x48] sm:$0xff] %v1797_v0  ;;  %v1802_v4 = vmax.f32 %v1782_v54, 0.0  ;;  %v1774_v10 = vadd.f32 %v1773_v58, %v1677_v42 }
 0x8ae   :  { %v2465_v40 = vpop.f32.mrf.mxu1 }
 0x8af   :  { %1818 = vst [vmem:[#allocation11 + $0x70] sm:$0xff] %v1802_v4  ;;  %v1800_v43 = vmax.f32 %v1774_v10, 0.0  ;;  %v1785_v61 = vadd.f32 %v2465_v40, %v1688_v8 }
 0x8b0   :  { %v1776_v53 = vpop.f32.mrf.mxu1 }
 0x8b1   :  { %1816 = vst [vmem:[#allocation11 + $0x60] sm:$0xff] %v1800_v43  ;;  %v1803_v56 = vmax.f32 %v1785_v61, 0.0  ;;  %v1777_v32 = vadd.f32 %v1776_v53, %v1680_v47 }
 0x8b3   :  { %1819 = vst [vmem:[#allocation11 + $0x78] sm:$0xff] %v1803_v56  ;;  %v1801_v13 = vmax.f32 %v1777_v32, 0.0 }
 0x8b5   :  { %1817 = vst [vmem:[#allocation11 + $0x68] sm:$0xff] %v1801_v13 }
 0x8b6   :  { %2585 = shalt.err (!%p2582_p1)
}
 0x8b7   :  { %1831 = dma.vmem_to_hbm [thread:$0]  %s1826_s9, 2048, %s3353_s8, [#allocation4], %s2604_s10, %s2604_s10, %s2605_s11  }
 0x8b8   :  { %2600 = dma.done.wait [#allocation4], 2048  }
 0x8b9   :  { %2601 = vsyncadd [#allocation4], 4294965248 }
 0x8ba   :  { %1835 = vsyncpa [#allocation3], 1 }
 0x8bb   :  { %1836 = vsyncpa [#allocation6], 1 }
 0x8bc   :  { %1837 = vsyncpa [#allocation9], 1 }
 0x8bd   :  { %1838 = vsyncpa [#allocation4], 1 }

</bundles_post_ra>
